<compile_context>
chip_gen: v5e
topology: v5e:2x2
jax: 0.10.0
libtpu: 0.0.40
codegen_flags: <defaults>
</compile_context>

<pallas_src>
import jax
import jax.numpy as jnp
from jax.experimental import pallas as pl
from jax.experimental.pallas import tpu as pltpu

HIDDEN = 1700          # fixed by the module definition (nn.Linear(input_size, 1700))
HIDDEN_PAD = 1792      # 14 * 128 -> lane-aligned hidden dim (zero padding)


def mlp_kernel(x_ref, w1_ref, b1_ref, w2_ref, b2_ref, o_ref):
    # x arrives f32; cast to bf16 in-kernel (VPU work hidden under the MXU).
    x = x_ref[...].astype(jnp.bfloat16)
    # fc1: [tm, D]bf16 @ [D, Hp]bf16 -> f32 accum on the MXU
    h = jnp.dot(x, w1_ref[...], preferred_element_type=jnp.float32)
    h = jnp.maximum(h + b1_ref[...], 0.0)        # f32 bias add + ReLU on the VPU
    # Dropout(p=0.5): identity in eval/inference mode.
    # TODO(synk): training-mode stochastic dropout (pltpu.prng_random_bits +
    # 1/(1-p) scaling) not applied.
    # fc2: [tm, Hp]bf16 @ [Hp, C]bf16 -> f32 accum on the MXU
    out = jnp.dot(h.astype(jnp.bfloat16), w2_ref[...],
                  preferred_element_type=jnp.float32)
    o_ref[...] = (out + b2_ref[...]).astype(o_ref.dtype)


def _pick_tm(B):
    """Batch-tile size.

    * B <= 128: single full-array block (latency regime, no padding needed).
    * B  > 128: multiple of 128, capped at 512 (amortizes the ~0.35 us/step
      overhead; safe under v5e's 16 MiB scoped-VMEM default), and no larger
      than round_up(B/2, 128) so the grid has >= 2 steps for v7x's two TCs.
    """
    if B <= 128:
        return B
    half_up = ((-(-B // 2)) + 127) // 128 * 128
    return min(512, half_up)


def _build_call(B_pad, D, Hp, C, tm, single_buffer_weights):
    grid = (B_pad // tm,)
    if single_buffer_weights:
        const_kwargs = dict(pipeline_mode=pl.Buffered(1))
    else:
        const_kwargs = {}
    in_specs = [
        pl.BlockSpec((tm, D), lambda i: (i, 0)),                    # x tile moves with grid
        pl.BlockSpec((D, Hp), lambda i: (0, 0), **const_kwargs),    # weights stay resident
        pl.BlockSpec((1, Hp), lambda i: (0, 0), **const_kwargs),
        pl.BlockSpec((Hp, C), lambda i: (0, 0), **const_kwargs),
        pl.BlockSpec((1, C), lambda i: (0, 0), **const_kwargs),
    ]
    return pl.pallas_call(
        mlp_kernel,
        out_shape=jax.ShapeDtypeStruct((B_pad, C), jnp.float32),
        grid_spec=pltpu.PrefetchScalarGridSpec(
            num_scalar_prefetch=0,
            grid=grid,
            in_specs=in_specs,
            out_specs=pl.BlockSpec((tm, C), lambda i: (i, 0)),
        ),
        compiler_params=pltpu.CompilerParams(
            dimension_semantics=("parallel",),
        ),
    )


def simple_nn2_forward(x, w1, b1, w2, b2, num_classes):
    """x: [B, D] f32. w1/w2: bf16 (hidden dim padded). b1/b2: f32.
    Returns [B, num_classes] f32."""
    B, D = x.shape
    Hp = w1.shape[1]
    C = w2.shape[1]

    tm = _pick_tm(B)
    B_pad = (-(-B // tm)) * tm
    x_p = x if B_pad == B else jnp.pad(x, ((0, B_pad - B), (0, 0)))

    try:
        out = jax.block_until_ready(
            _build_call(B_pad, D, Hp, C, tm, True)(x_p, w1, b1, w2, b2))
    except Exception:
        # Fallback if pipeline_mode=pl.Buffered(1) is unsupported in this JAX.
        out = _build_call(B_pad, D, Hp, C, tm, False)(x_p, w1, b1, w2, b2)

    return out[:B, :num_classes]


def init_params(key, input_size, num_classes):
    # Deterministic init mimicking PyTorch's default U(-1/sqrt(fan_in), 1/sqrt(fan_in)),
    # in the true (unpadded) shapes.
    k1, k2, k3, k4 = jax.random.split(key, 4)
    bound1 = 1.0 / jnp.sqrt(input_size)
    bound2 = 1.0 / jnp.sqrt(HIDDEN)
    w1 = jax.random.uniform(k1, (input_size, HIDDEN), jnp.float32, -bound1, bound1)
    b1 = jax.random.uniform(k2, (1, HIDDEN), jnp.float32, -bound1, bound1)
    w2 = jax.random.uniform(k3, (HIDDEN, num_classes), jnp.float32, -bound2, bound2)
    b2 = jax.random.uniform(k4, (1, num_classes), jnp.float32, -bound2, bound2)
    return w1, b1, w2, b2


def pad_params(w1, b1, w2, b2):
    """Zero-pad hidden dim to HIDDEN_PAD and cast weights to bf16.

    No class-dim padding (saves ~94% of the dominant w2 DMA at small batch).
    Padding is zeros, so math is unchanged: padded hidden units give
    ReLU(0+0)=0 and multiply zero rows of w2.
    """
    dh = HIDDEN_PAD - HIDDEN
    w1p = jnp.pad(w1, ((0, 0), (0, dh))).astype(jnp.bfloat16)
    b1p = jnp.pad(b1, ((0, 0), (0, dh)))                       # f32
    w2p = jnp.pad(w2, ((0, dh), (0, 0))).astype(jnp.bfloat16)
    b2p = b2                                                    # f32, (1, C)
    return w1p, b1p, w2p, b2p


if __name__ == "__main__":
    # Small, module-consistent shapes: batch=8, input_size=64, num_classes=8.
    batch, input_size, num_classes = 8, 64, 8

    key = jax.random.PRNGKey(0)
    kx, kp = jax.random.split(key)
    x = jax.random.normal(kx, (batch, input_size), jnp.float32)
    w1, b1, w2, b2 = init_params(kp, input_size, num_classes)
    w1p, b1p, w2p, b2p = pad_params(w1, b1, w2, b2)

    out = simple_nn2_forward(x, w1p, b1p, w2p, b2p, num_classes)
    out = jax.block_until_ready(out)
    assert out.shape == (batch, num_classes)

    # Exact-semantics check: reference uses the same bf16-rounded operands with
    # f32 accumulation (matches the MXU path).
    w1q = w1p[:, :HIDDEN].astype(jnp.float32)
    w2q = w2p[:HIDDEN, :].astype(jnp.float32)
    xq = x.astype(jnp.bfloat16).astype(jnp.float32)
    h_ref = jnp.maximum(xq @ w1q + b1, 0.0)
    ref_q = h_ref.astype(jnp.bfloat16).astype(jnp.float32) @ w2q + b2
    assert jnp.allclose(out, ref_q, atol=2e-3, rtol=2e-3)

    # Loose check against the pure-f32 reference (bf16 quantization error only).
    ref_f32 = jnp.maximum(x @ w1 + b1, 0.0) @ w2 + b2
    assert jnp.allclose(out, ref_f32, atol=5e-2, rtol=5e-2)

    # Second call with a ragged, larger batch to exercise the tiled/padded path
    # (tm=256, grid of 2 "parallel" steps, 200 zero rows of padding sliced off).
    xb = jax.random.normal(jax.random.PRNGKey(1), (300, input_size), jnp.float32)
    outb = jax.block_until_ready(
        simple_nn2_forward(xb, w1p, b1p, w2p, b2p, num_classes))
    assert outb.shape == (300, num_classes)
    xbq = xb.astype(jnp.bfloat16).astype(jnp.float32)
    hb_ref = jnp.maximum(xbq @ w1q + b1, 0.0)
    refb_q = hb_ref.astype(jnp.bfloat16).astype(jnp.float32) @ w2q + b2
    assert jnp.allclose(outb, refb_q, atol=2e-3, rtol=2e-3)

    print("KERNEL_OK")
</pallas_src>

<mosaic_0001>
module attributes {stable_mosaic.version = 11 : i64} {
  func.func @mlp_kernel(%arg0: i32, %arg1: memref<8x64xf32, #tpu.memory_space<vmem>>, %arg2: memref<64x1792xbf16, #tpu.memory_space<vmem>>, %arg3: memref<1x1792xf32, #tpu.memory_space<vmem>>, %arg4: memref<1792x8xbf16, #tpu.memory_space<vmem>>, %arg5: memref<1x8xf32, #tpu.memory_space<vmem>>, %arg6: memref<8x8xf32, #tpu.memory_space<vmem>>) attributes {dimension_semantics = [#tpu.dimension_semantics<parallel>], iteration_bounds = array<i64: 1>, scalar_prefetch = 0 : i64, scratch_operands = 0 : i64, tpu.core_type = #tpu.core_type<tc>, window_params = [{transform_indices = @transform_0, window_bounds = array<i64: 8, 64>}, {pipeline_mode = #tpu.pipeline_mode<synchronous>, transform_indices = @transform_1, window_bounds = array<i64: 64, 1792>}, {pipeline_mode = #tpu.pipeline_mode<synchronous>, transform_indices = @transform_2, window_bounds = array<i64: 1, 1792>}, {pipeline_mode = #tpu.pipeline_mode<synchronous>, transform_indices = @transform_3, window_bounds = array<i64: 1792, 8>}, {pipeline_mode = #tpu.pipeline_mode<synchronous>, transform_indices = @transform_4, window_bounds = array<i64: 1, 8>}, {transform_indices = @transform_5, window_bounds = array<i64: 8, 8>}]} {
    %c0 = arith.constant 0 : index
    %c0_0 = arith.constant 0 : index
    %0 = vector.load %arg1[%c0, %c0_0] : memref<8x64xf32, #tpu.memory_space<vmem>>, vector<8x64xf32>
    %1 = arith.truncf %0 : vector<8x64xf32> to vector<8x64xbf16>
    %c0_1 = arith.constant 0 : index
    %c0_2 = arith.constant 0 : index
    %2 = vector.load %arg2[%c0_1, %c0_2] : memref<64x1792xbf16, #tpu.memory_space<vmem>>, vector<64x1792xbf16>
    %cst = arith.constant dense<0.000000e+00> : vector<8x1792xf32>
    %3 = tpu.matmul %1, %2, %cst {dimension_numbers = #tpu.dot_dimension_numbers<[1], [0], [0], [1], [0, 0, 1, 1], [], []>} : vector<8x64xbf16>, vector<64x1792xbf16>, vector<8x1792xf32> -> vector<8x1792xf32>
    %c0_3 = arith.constant 0 : index
    %c0_4 = arith.constant 0 : index
    %4 = vector.load %arg3[%c0_3, %c0_4] : memref<1x1792xf32, #tpu.memory_space<vmem>>, vector<1x1792xf32>
    %5 = vector.broadcast %4 : vector<1x1792xf32> to vector<8x1792xf32>
    %6 = arith.addf %3, %5 : vector<8x1792xf32>
    %cst_5 = arith.constant 0.000000e+00 : f32
    %7 = vector.broadcast %cst_5 : f32 to vector<8x1792xf32>
    %8 = arith.maximumf %6, %7 : vector<8x1792xf32>
    %9 = arith.truncf %8 : vector<8x1792xf32> to vector<8x1792xbf16>
    %c0_6 = arith.constant 0 : index
    %c0_7 = arith.constant 0 : index
    %10 = vector.load %arg4[%c0_6, %c0_7] : memref<1792x8xbf16, #tpu.memory_space<vmem>>, vector<1792x8xbf16>
    %cst_8 = arith.constant dense<0.000000e+00> : vector<8x8xf32>
    %11 = tpu.matmul %9, %10, %cst_8 {dimension_numbers = #tpu.dot_dimension_numbers<[1], [0], [0], [1], [0, 0, 1, 1], [], []>} : vector<8x1792xbf16>, vector<1792x8xbf16>, vector<8x8xf32> -> vector<8x8xf32>
    %c0_9 = arith.constant 0 : index
    %c0_10 = arith.constant 0 : index
    %12 = vector.load %arg5[%c0_9, %c0_10] : memref<1x8xf32, #tpu.memory_space<vmem>>, vector<1x8xf32>
    %13 = vector.broadcast %12 : vector<1x8xf32> to vector<8x8xf32>
    %14 = arith.addf %11, %13 : vector<8x8xf32>
    %c0_11 = arith.constant 0 : index
    %c0_12 = arith.constant 0 : index
    %15 = vector.load %arg6[%c0_11, %c0_12] : memref<8x8xf32, #tpu.memory_space<vmem>>, vector<8x8xf32>
    tpu.vector_store %arg6[%c0_11, %c0_12], %14 {strides = array<i32>} : memref<8x8xf32, #tpu.memory_space<vmem>>, vector<8x8xf32>,
    return
  }
  func.func @transform_0(%arg0: i32) -> (i32, i32) {
    %c0_i32 = arith.constant 0 : i32
    %c0_i32_0 = arith.constant 0 : i32
    return %arg0, %c0_i32 : i32, i32
  }
  func.func @transform_1(%arg0: i32) -> (i32, i32) {
    %c0_i32 = arith.constant 0 : i32
    %c0_i32_0 = arith.constant 0 : i32
    %c0_i32_1 = arith.constant 0 : i32
    return %c0_i32, %c0_i32_0 : i32, i32
  }
  func.func @transform_2(%arg0: i32) -> (i32, i32) {
    %c0_i32 = arith.constant 0 : i32
    %c0_i32_0 = arith.constant 0 : i32
    %c0_i32_1 = arith.constant 0 : i32
    return %c0_i32, %c0_i32_0 : i32, i32
  }
  func.func @transform_3(%arg0: i32) -> (i32, i32) {
    %c0_i32 = arith.constant 0 : i32
    %c0_i32_0 = arith.constant 0 : i32
    %c0_i32_1 = arith.constant 0 : i32
    return %c0_i32, %c0_i32_0 : i32, i32
  }
  func.func @transform_4(%arg0: i32) -> (i32, i32) {
    %c0_i32 = arith.constant 0 : i32
    %c0_i32_0 = arith.constant 0 : i32
    %c0_i32_1 = arith.constant 0 : i32
    return %c0_i32, %c0_i32_0 : i32, i32
  }
  func.func @transform_5(%arg0: i32) -> (i32, i32) {
    %c0_i32 = arith.constant 0 : i32
    %c0_i32_0 = arith.constant 0 : i32
    return %arg0, %c0_i32 : i32, i32
  }
}

module attributes {stable_mosaic.version = 11 : i64} {
  func.func @mlp_kernel(%arg0: i32, %arg1: memref<8x64xf32, #tpu.memory_space<vmem>>, %arg2: memref<64x1792xbf16, #tpu.memory_space<vmem>>, %arg3: memref<1x1792xf32, #tpu.memory_space<vmem>>, %arg4: memref<1792x8xbf16, #tpu.memory_space<vmem>>, %arg5: memref<1x8xf32, #tpu.memory_space<vmem>>, %arg6: memref<8x8xf32, #tpu.memory_space<vmem>>) attributes {dimension_semantics = [#tpu.dimension_semantics<parallel>], iteration_bounds = array<i64: 1>, scalar_prefetch = 0 : i64, scratch_operands = 0 : i64, tpu.core_type = #tpu.core_type<tc>, window_params = [{transform_indices = @transform_0, window_bounds = array<i64: 8, 64>}, {pipeline_mode = #tpu.pipeline_mode<synchronous>, transform_indices = @transform_1, window_bounds = array<i64: 64, 1792>}, {pipeline_mode = #tpu.pipeline_mode<synchronous>, transform_indices = @transform_2, window_bounds = array<i64: 1, 1792>}, {pipeline_mode = #tpu.pipeline_mode<synchronous>, transform_indices = @transform_3, window_bounds = array<i64: 1792, 8>}, {pipeline_mode = #tpu.pipeline_mode<synchronous>, transform_indices = @transform_4, window_bounds = array<i64: 1, 8>}, {transform_indices = @transform_5, window_bounds = array<i64: 8, 8>}]} {
    %c0 = arith.constant 0 : index
    %c0_0 = arith.constant 0 : index
    %0 = vector.load %arg1[%c0, %c0_0] : memref<8x64xf32, #tpu.memory_space<vmem>>, vector<8x64xf32>
    %1 = arith.truncf %0 : vector<8x64xf32> to vector<8x64xbf16>
    %c0_1 = arith.constant 0 : index
    %c0_2 = arith.constant 0 : index
    %2 = vector.load %arg2[%c0_1, %c0_2] : memref<64x1792xbf16, #tpu.memory_space<vmem>>, vector<64x1792xbf16>
    %cst = arith.constant dense<0.000000e+00> : vector<8x1792xf32>
    %3 = tpu.matmul %1, %2, %cst {dimension_numbers = #tpu.dot_dimension_numbers<[1], [0], [0], [1], [0, 0, 1, 1], [], []>} : vector<8x64xbf16>, vector<64x1792xbf16>, vector<8x1792xf32> -> vector<8x1792xf32>
    %c0_3 = arith.constant 0 : index
    %c0_4 = arith.constant 0 : index
    %4 = vector.load %arg3[%c0_3, %c0_4] : memref<1x1792xf32, #tpu.memory_space<vmem>>, vector<1x1792xf32>
    %5 = vector.broadcast %4 : vector<1x1792xf32> to vector<8x1792xf32>
    %6 = arith.addf %3, %5 : vector<8x1792xf32>
    %cst_5 = arith.constant 0.000000e+00 : f32
    %7 = vector.broadcast %cst_5 : f32 to vector<8x1792xf32>
    %8 = arith.maximumf %6, %7 : vector<8x1792xf32>
    %9 = arith.truncf %8 : vector<8x1792xf32> to vector<8x1792xbf16>
    %c0_6 = arith.constant 0 : index
    %c0_7 = arith.constant 0 : index
    %10 = vector.load %arg4[%c0_6, %c0_7] : memref<1792x8xbf16, #tpu.memory_space<vmem>>, vector<1792x8xbf16>
    %cst_8 = arith.constant dense<0.000000e+00> : vector<8x8xf32>
    %11 = tpu.matmul %9, %10, %cst_8 {dimension_numbers = #tpu.dot_dimension_numbers<[1], [0], [0], [1], [0, 0, 1, 1], [], []>} : vector<8x1792xbf16>, vector<1792x8xbf16>, vector<8x8xf32> -> vector<8x8xf32>
    %c0_9 = arith.constant 0 : index
    %c0_10 = arith.constant 0 : index
    %12 = vector.load %arg5[%c0_9, %c0_10] : memref<1x8xf32, #tpu.memory_space<vmem>>, vector<1x8xf32>
    %13 = vector.broadcast %12 : vector<1x8xf32> to vector<8x8xf32>
    %14 = arith.addf %11, %13 : vector<8x8xf32>
    %c0_11 = arith.constant 0 : index
    %c0_12 = arith.constant 0 : index
    %15 = vector.load %arg6[%c0_11, %c0_12] : memref<8x8xf32, #tpu.memory_space<vmem>>, vector<8x8xf32>
    tpu.vector_store %arg6[%c0_11, %c0_12], %14 {strides = array<i32>} : memref<8x8xf32, #tpu.memory_space<vmem>>, vector<8x8xf32>,
    return
  }
  func.func @transform_0(%arg0: i32) -> (i32, i32) {
    %c0_i32 = arith.constant 0 : i32
    %c0_i32_0 = arith.constant 0 : i32
    return %arg0, %c0_i32 : i32, i32
  }
  func.func @transform_1(%arg0: i32) -> (i32, i32) {
    %c0_i32 = arith.constant 0 : i32
    %c0_i32_0 = arith.constant 0 : i32
    %c0_i32_1 = arith.constant 0 : i32
    return %c0_i32, %c0_i32_0 : i32, i32
  }
  func.func @transform_2(%arg0: i32) -> (i32, i32) {
    %c0_i32 = arith.constant 0 : i32
    %c0_i32_0 = arith.constant 0 : i32
    %c0_i32_1 = arith.constant 0 : i32
    return %c0_i32, %c0_i32_0 : i32, i32
  }
  func.func @transform_3(%arg0: i32) -> (i32, i32) {
    %c0_i32 = arith.constant 0 : i32
    %c0_i32_0 = arith.constant 0 : i32
    %c0_i32_1 = arith.constant 0 : i32
    return %c0_i32, %c0_i32_0 : i32, i32
  }
  func.func @transform_4(%arg0: i32) -> (i32, i32) {
    %c0_i32 = arith.constant 0 : i32
    %c0_i32_0 = arith.constant 0 : i32
    %c0_i32_1 = arith.constant 0 : i32
    return %c0_i32, %c0_i32_0 : i32, i32
  }
  func.func @transform_5(%arg0: i32) -> (i32, i32) {
    %c0_i32 = arith.constant 0 : i32
    %c0_i32_0 = arith.constant 0 : i32
    return %arg0, %c0_i32 : i32, i32
  }
}

</mosaic_0001>

<bundles_post_ra>
// kernel: tpu_custom_call.1
= control target key start
LH: loop header
LB: loop body
LE: loop exit
PB: predicated region body
PF: predicated region fallthrough
CT: control target
= control target key end

     0   :  { %vm392_vm0 = vcmask 523264   ;;  %s3354_s0 = inlined_call_operand.vmem [shape: f32[8,64], index: 0, kind: input, shape index: {}]   ;;  %s3355_s1 = inlined_call_operand.vmem [shape: bf16[64,1792], index: 1, kind: input, shape index: {}]   ;;  %s3356_s2 = inlined_call_operand.vmem [shape: f32[1,1792], index: 2, kind: input, shape index: {}]   ;;  %s3357_s3 = inlined_call_operand.vmem [shape: bf16[1792,8], index: 3, kind: input, shape index: {}]   ;;  %s3358_s4 = inlined_call_operand.vmem [shape: f32[1,8], index: 4, kind: input, shape index: {}]   ;;  %s3359_s5 = inlined_call_operand.hbm [shape: f32[8,8], index: 5, kind: output, shape index: {}]  }
   0x1   :  { %v1876_v0 = vld [vmem:[%s3355_s1 + $0x150] sm:$0xf]  ;;  %v2441_v1 = vld [vmem:[%s3355_s1 + $0x184] sm:$0xf0]  ;;  %v2434_v2 = vld [vmem:[%s3355_s1 + $0x154] sm:$0xf] }
   0x2   :  { %v1877_v3 = vor.u32 %v2441_v1, %v1876_v0  ;;  %v1878_v4 = vld [vmem:[%s3355_s1 + $0x188] sm:$0xf0]  ;;  %v1820_v5 = vld [vmem:[%s3355_s1 + $0xe0] sm:$0xf]  ;;  %v2427_v6 = vld [vmem:[%s3355_s1 + $0x114] sm:$0xf0] }
   0x3   :  { %v1881_v7 = vor.u32 %v2434_v2, %v1878_v4  ;;  %v2420_v8 = vld [vmem:[%s3355_s1 + $0xe4] sm:$0xf]  ;;  %v1822_v9 = vld [vmem:[%s3355_s1 + $0x118] sm:$0xf0]  ;;  %v1884_v10 = vld [vmem:[%s3355_s1 + $0x158] sm:$0xf]  ;;  %v1821_v11 = vor.u32 %v2427_v6, %v1820_v5 }
   0x4   :  { %400 = vmatpush.bf16.msra.mxu0 %v1877_v3  ;;  %v2442_v12 = vld [vmem:[%s3355_s1 + $0x18c] sm:$0xf0]  ;;  %v2435_v13 = vld [vmem:[%s3355_s1 + $0x15c] sm:$0xf]  ;;  %v1886_v14 = vld [vmem:[%s3355_s1 + $0x190] sm:$0xf0]  ;;  %v1825_v15 = vor.u32 %v2420_v8, %v1822_v9 }
   0x5   :  { %413 = vmatpush.bf16.msra.mxu1 %v1881_v7  ;;  %v1885_v16 = vor.u32 %v2442_v12, %v1884_v10  ;;  %v1889_v17 = vor.u32 %v2435_v13, %v1886_v14  ;;  %v1764_v18 = vld [vmem:[%s3355_s1 + $0x70] sm:$0xf]  ;;  %v2413_v19 = vld [vmem:[%s3355_s1 + $0xa4] sm:$0xf0]  ;;  %v2406_v20 = vld [vmem:[%s3355_s1 + $0x74] sm:$0xf] }
   0x6   :  { %v1766_v21 = vld [vmem:[%s3355_s1 + $0xa8] sm:$0xf0]  ;;  %v1828_v22 = vld [vmem:[%s3355_s1 + $0xe8] sm:$0xf]  ;;  %v2428_v23 = vld [vmem:[%s3355_s1 + $0x11c] sm:$0xf0]  ;;  %v1765_v27 = vor.u32 %v2413_v19, %v1764_v18 }
   0x7   :  { %426 = vmatpush.bf16.msra.mxu2 %v1885_v16  ;;  %439 = vmatpush.bf16.msra.mxu3 %v1889_v17  ;;  %v1829_v24 = vor.u32 %v2428_v23, %v1828_v22  ;;  %v2421_v25 = vld [vmem:[%s3355_s1 + $0xec] sm:$0xf]  ;;  %v1830_v26 = vld [vmem:[%s3355_s1 + $0x120] sm:$0xf0]  ;;  %v1708_v29 = vld [vmem:[%s3355_s1] sm:$0xf]  ;;  %v1769_v32 = vor.u32 %v2406_v20, %v1766_v21 }
   0x8   :  { %401 = vmatpush.bf16.msra.mxu0 %v1821_v11  ;;  %v1833_v28 = vor.u32 %v2421_v25, %v1830_v26  ;;  %v2399_v30 = vld [vmem:[%s3355_s1 + $0x34] sm:$0xf0]  ;;  %v2392_v31 = vld [vmem:[%s3355_s1 + $0x4] sm:$0xf]  ;;  %v2414_v34 = vld [vmem:[%s3355_s1 + $0xac] sm:$0xf0] }
   0x9   :  { %414 = vmatpush.bf16.msra.mxu1 %v1825_v15  ;;  %v1772_v33 = vld [vmem:[%s3355_s1 + $0x78] sm:$0xf]  ;;  %v2407_v35 = vld [vmem:[%s3355_s1 + $0x7c] sm:$0xf]  ;;  %v1774_v37 = vld [vmem:[%s3355_s1 + $0xb0] sm:$0xf0]  ;;  %v1709_v44 = vor.u32 %v2399_v30, %v1708_v29 }
   0xa   :  { %v1710_v36 = vld [vmem:[%s3355_s1 + $0x38] sm:$0xf0]  ;;  %v22_v38 = vld [vmem:[%s3354_s0] sm:$0xff]  ;;  %v1773_v39 = vor.u32 %v2414_v34, %v1772_v33  ;;  %v1777_v40 = vor.u32 %v2407_v35, %v1774_v37  ;;  %v1716_v41 = vld [vmem:[%s3355_s1 + $0x8] sm:$0xf] }
   0xb   :  { %427 = vmatpush.bf16.msra.mxu2 %v1829_v24  ;;  %440 = vmatpush.bf16.msra.mxu3 %v1833_v28  ;;  %v1892_v42 = vld [vmem:[%s3355_s1 + $0x160] sm:$0xf]  ;;  %v2443_v43 = vld [vmem:[%s3355_s1 + $0x194] sm:$0xf0]  ;;  %v2393_v46 = vld [vmem:[%s3355_s1 + $0xc] sm:$0xf]  ;;  %v1713_v48 = vor.u32 %v2392_v31, %v1710_v36  ;;  %v2742_v57 = vpack.c.bf16 %v22_v38, %v22_v38 }
   0xc   :  { %402 = vmatpush.bf16.msra.mxu0 %v1765_v27  ;;  %v2400_v45 = vld [vmem:[%s3355_s1 + $0x3c] sm:$0xf0]  ;;  %v2436_v47 = vld [vmem:[%s3355_s1 + $0x164] sm:$0xf]  ;;  %v1893_v49 = vor.u32 %v2443_v43, %v1892_v42  ;;  %v1894_v51 = vld [vmem:[%s3355_s1 + $0x198] sm:$0xf0] }
   0xd   :  { %415 = vmatpush.bf16.msra.mxu1 %v1769_v32  ;;  %v1718_v50 = vld [vmem:[%s3355_s1 + $0x40] sm:$0xf0]  ;;  %v1836_v52 = vld [vmem:[%s3355_s1 + $0xf0] sm:$0xf]  ;;  %v1897_v53 = vor.u32 %v2436_v47, %v1894_v51  ;;  %v2429_v54 = vld [vmem:[%s3355_s1 + $0x124] sm:$0xf0]  ;;  %v1717_v58 = vor.u32 %v2400_v45, %v1716_v41 }
   0xe   :  { %v1900_v55 = vld [vmem:[%s3355_s1 + $0x168] sm:$0xf]  ;;  %v2444_v56 = vld [vmem:[%s3355_s1 + $0x19c] sm:$0xf0]  ;;  %v2422_v59 = vld [vmem:[%s3355_s1 + $0xf4] sm:$0xf]  ;;  %v1721_v61 = vor.u32 %v2393_v46, %v1718_v50  ;;  %v1837_v62 = vor.u32 %v2429_v54, %v1836_v52 }
   0xf   :  { %428 = vmatpush.bf16.msra.mxu2 %v1773_v39  ;;  %441 = vmatpush.bf16.msra.mxu3 %v1777_v40  ;;  %v1838_v60 = vld [vmem:[%s3355_s1 + $0x128] sm:$0xf0]  ;;  %v1901_v63 = vor.u32 %v2444_v56, %v1900_v55  ;;  %v1902_v1 = vld [vmem:[%s3355_s1 + $0x1a0] sm:$0xf0]  ;;  %v1780_v2 = vld [vmem:[%s3355_s1 + $0x80] sm:$0xf] }
  0x10   :  { %403 = vmatpush.bf16.msra.mxu0 %v1709_v44  ;;  %v2437_v0 = vld [vmem:[%s3355_s1 + $0x16c] sm:$0xf]  ;;  %v1841_v3 = vor.u32 %v2422_v59, %v1838_v60  ;;  %v2415_v4 = vld [vmem:[%s3355_s1 + $0xb4] sm:$0xf0]  ;;  %v2430_v6 = vld [vmem:[%s3355_s1 + $0x12c] sm:$0xf0] }
  0x11   :  { %416 = vmatpush.bf16.msra.mxu1 %v1713_v48  ;;  %v1844_v5 = vld [vmem:[%s3355_s1 + $0xf8] sm:$0xf]  ;;  %v2408_v7 = vld [vmem:[%s3355_s1 + $0x84] sm:$0xf]  ;;  %v1782_v8 = vld [vmem:[%s3355_s1 + $0xb8] sm:$0xf0]  ;;  %v1905_v9 = vor.u32 %v2437_v0, %v1902_v1  ;;  %v1781_v11 = vor.u32 %v2415_v4, %v1780_v2 }
  0x12   :  { %v2423_v10 = vld [vmem:[%s3355_s1 + $0xfc] sm:$0xf]  ;;  %v1845_v12 = vor.u32 %v2430_v6, %v1844_v5  ;;  %v1846_v13 = vld [vmem:[%s3355_s1 + $0x130] sm:$0xf0]  ;;  %v1724_v14 = vld [vmem:[%s3355_s1 + $0x10] sm:$0xf]  ;;  %v1785_v16 = vor.u32 %v2408_v7, %v1782_v8 }
  0x13   :  { %1930 = vmatmul.msk.bf16.vlgmr.msra.gmra.mxu0 %vm392_vm0, %v2742_v57  ;;  %429 = vmatpush.bf16.msra.mxu2 %v1717_v58  ;;  %v2401_v15 = vld [vmem:[%s3355_s1 + $0x44] sm:$0xf0]  ;;  %v2416_v18 = vld [vmem:[%s3355_s1 + $0xbc] sm:$0xf0]  ;;  %v2394_v19 = vld [vmem:[%s3355_s1 + $0x14] sm:$0xf]  ;;  %v1849_v23 = vor.u32 %v2423_v10, %v1846_v13 }
  0x14   :  { %452 = vmatpush.bf16.msrb.mxu0 %v1893_v49  ;;  %1931 = vmatmul.msk.bf16.vlgmr.msra.gmra.mxu1 %vm392_vm0, %v2742_v57  ;;  %v1788_v17 = vld [vmem:[%s3355_s1 + $0x88] sm:$0xf]  ;;  %v1726_v20 = vld [vmem:[%s3355_s1 + $0x48] sm:$0xf0]  ;;  %v1908_v21 = vld [vmem:[%s3355_s1 + $0x170] sm:$0xf]  ;;  %v1725_v26 = vor.u32 %v2401_v15, %v1724_v14 }
  0x15   :  { %465 = vmatpush.bf16.msrb.mxu1 %v1897_v53  ;;  %442 = vmatpush.bf16.msra.mxu3 %v1721_v61  ;;  %v2445_v22 = vld [vmem:[%s3355_s1 + $0x1a4] sm:$0xf0]  ;;  %v2438_v24 = vld [vmem:[%s3355_s1 + $0x174] sm:$0xf]  ;;  %v1910_v25 = vld [vmem:[%s3355_s1 + $0x1a8] sm:$0xf0]  ;;  %v1789_v27 = vor.u32 %v2416_v18, %v1788_v17  ;;  %v1729_v30 = vor.u32 %v2394_v19, %v1726_v20 }
  0x16   :  { %1932 = vmatmul.msk.bf16.vlgmr.msra.gmra.mxu2 %vm392_vm0, %v2742_v57  ;;  %v2409_v28 = vld [vmem:[%s3355_s1 + $0x8c] sm:$0xf]  ;;  %v1790_v29 = vld [vmem:[%s3355_s1 + $0xc0] sm:$0xf0]  ;;  %v1732_v31 = vld [vmem:[%s3355_s1 + $0x18] sm:$0xf]  ;;  %v1909_v33 = vor.u32 %v2445_v22, %v1908_v21  ;;  %v1913_v35 = vor.u32 %v2438_v24, %v1910_v25 }
  0x17   :  { %478 = vmatpush.bf16.msrb.mxu2 %v1901_v63  ;;  %v2402_v32 = vld [vmem:[%s3355_s1 + $0x4c] sm:$0xf0]  ;;  %v1852_v34 = vld [vmem:[%s3355_s1 + $0x100] sm:$0xf]  ;;  %v2431_v36 = vld [vmem:[%s3355_s1 + $0x134] sm:$0xf0]  ;;  %v1793_v39 = vor.u32 %v2409_v28, %v1790_v29 }
  0x18   :  { %453 = vmatpush.bf16.msrb.mxu0 %v1837_v62  ;;  %1933 = vmatmul.msk.bf16.vlgmr.msra.gmra.mxu3 %vm392_vm0, %v2742_v57  ;;  %v1916_v37 = vld [vmem:[%s3355_s1 + $0x178] sm:$0xf]  ;;  %v2446_v38 = vld [vmem:[%s3355_s1 + $0x1ac] sm:$0xf0]  ;;  %v2424_v40 = vld [vmem:[%s3355_s1 + $0x104] sm:$0xf]  ;;  %v1733_v42 = vor.u32 %v2402_v32, %v1732_v31  ;;  %v1853_v45 = vor.u32 %v2431_v36, %v1852_v34 }
  0x19   :  { %466 = vmatpush.bf16.msrb.mxu1 %v1841_v3  ;;  %491 = vmatpush.bf16.msrb.mxu3 %v1905_v9  ;;  %v1854_v41 = vld [vmem:[%s3355_s1 + $0x138] sm:$0xf0]  ;;  %v1734_v44 = vld [vmem:[%s3355_s1 + $0x50] sm:$0xf0]  ;;  %v1917_v46 = vor.u32 %v2446_v38, %v1916_v37  ;;  %v1796_v50 = vld [vmem:[%s3355_s1 + $0x90] sm:$0xf] }
  0x1a   :  { %v2395_v43 = vld [vmem:[%s3355_s1 + $0x1c] sm:$0xf]  ;;  %v1918_v48 = vld [vmem:[%s3355_s1 + $0x1b0] sm:$0xf0]  ;;  %v1857_v49 = vor.u32 %v2424_v40, %v1854_v41  ;;  %v2417_v51 = vld [vmem:[%s3355_s1 + $0xc4] sm:$0xf0] }
  0x1b   :  { %479 = vmatpush.bf16.msrb.mxu2 %v1845_v12  ;;  %v2439_v47 = vld [vmem:[%s3355_s1 + $0x17c] sm:$0xf]  ;;  %v1737_v52 = vor.u32 %v2395_v43, %v1734_v44  ;;  %v1860_v53 = vld [vmem:[%s3355_s1 + $0x108] sm:$0xf]  ;;  %v2432_v54 = vld [vmem:[%s3355_s1 + $0x13c] sm:$0xf0]  ;;  %v1797_v59 = vor.u32 %v2417_v51, %v1796_v50 }
  0x1c   :  { %454 = vmatpush.bf16.msrb.mxu0 %v1781_v11  ;;  %v1921_v55 = vor.u32 %v2439_v47, %v1918_v48  ;;  %v2410_v56 = vld [vmem:[%s3355_s1 + $0x94] sm:$0xf]  ;;  %v1798_v58 = vld [vmem:[%s3355_s1 + $0xc8] sm:$0xf0]  ;;  %v1862_v61 = vld [vmem:[%s3355_s1 + $0x140] sm:$0xf0]  ;;  %v1861_v62 = vor.u32 %v2432_v54, %v1860_v53 }
  0x1d   :  { %467 = vmatpush.bf16.msrb.mxu1 %v1785_v16  ;;  %492 = vmatpush.bf16.msrb.mxu3 %v1849_v23  ;;  %v2425_v60 = vld [vmem:[%s3355_s1 + $0x10c] sm:$0xf]  ;;  %v1740_v63 = vld [vmem:[%s3355_s1 + $0x20] sm:$0xf]  ;;  %v2403_v0 = vld [vmem:[%s3355_s1 + $0x54] sm:$0xf0]  ;;  %v1801_v2 = vor.u32 %v2410_v56, %v1798_v58 }
  0x1e   :  { %v1804_v1 = vld [vmem:[%s3355_s1 + $0x98] sm:$0xf]  ;;  %v2418_v3 = vld [vmem:[%s3355_s1 + $0xcc] sm:$0xf0]  ;;  %v1924_v4 = vld [vmem:[%s3355_s1 + $0x180] sm:$0xf]  ;;  %v1865_v6 = vor.u32 %v2425_v60, %v1862_v61  ;;  %v1741_v10 = vor.u32 %v2403_v0, %v1740_v63 }
  0x1f   :  { %480 = vmatpush.bf16.msrb.mxu2 %v1789_v27  ;;  %v2447_v5 = vld [vmem:[%s3355_s1 + $0x1b4] sm:$0xf0]  ;;  %v2396_v7 = vld [vmem:[%s3355_s1 + $0x24] sm:$0xf]  ;;  %v1742_v8 = vld [vmem:[%s3355_s1 + $0x58] sm:$0xf0]  ;;  %v1805_v14 = vor.u32 %v2418_v3, %v1804_v1 }
  0x20   :  { %455 = vmatpush.bf16.msrb.mxu0 %v1725_v26  ;;  %v2411_v9 = vld [vmem:[%s3355_s1 + $0x9c] sm:$0xf]  ;;  %v1806_v11 = vld [vmem:[%s3355_s1 + $0xd0] sm:$0xf0]  ;;  %v2440_v12 = vld [vmem:[%s3355_s1 + $0x184] sm:$0xf]  ;;  %v1925_v16 = vor.u32 %v2447_v5, %v1924_v4  ;;  %v1745_v17 = vor.u32 %v2396_v7, %v1742_v8 }
  0x21   :  { %468 = vmatpush.bf16.msrb.mxu1 %v1729_v30  ;;  %493 = vmatpush.bf16.msrb.mxu3 %v1793_v39  ;;  %v1926_v13 = vld [vmem:[%s3355_s1 + $0x1b8] sm:$0xf0]  ;;  %v1748_v15 = vld [vmem:[%s3355_s1 + $0x28] sm:$0xf]  ;;  %v2404_v18 = vld [vmem:[%s3355_s1 + $0x5c] sm:$0xf0]  ;;  %v1809_v21 = vor.u32 %v2411_v9, %v1806_v11 }
  0x22   :  { %v1868_v19 = vld [vmem:[%s3355_s1 + $0x110] sm:$0xf]  ;;  %v2433_v20 = vld [vmem:[%s3355_s1 + $0x144] sm:$0xf0]  ;;  %v2397_v22 = vld [vmem:[%s3355_s1 + $0x2c] sm:$0xf]  ;;  %v1929_v23 = vor.u32 %v2440_v12, %v1926_v13  ;;  %v1749_v27 = vor.u32 %v2404_v18, %v1748_v15 }
  0x23   :  { %481 = vmatpush.bf16.msrb.mxu2 %v1733_v42  ;;  %1934 = vmatmul.msk.bf16.vlgmr.msrb.gmra.mxu0 %vm392_vm0, %v2742_v57  ;;  %v1750_v24 = vld [vmem:[%s3355_s1 + $0x60] sm:$0xf0]  ;;  %v2426_v25 = vld [vmem:[%s3355_s1 + $0x114] sm:$0xf]  ;;  %v1870_v26 = vld [vmem:[%s3355_s1 + $0x148] sm:$0xf0]  ;;  %v1869_v28 = vor.u32 %v2433_v20, %v1868_v19 }
  0x24   :  { %504 = vmatpush.bf16.msra.mxu0 %v1909_v33  ;;  %1935 = vmatmul.msk.bf16.vlgmr.msrb.gmra.mxu1 %vm392_vm0, %v2742_v57  ;;  %v2455_v29 = vld [vmem:[%s3357_s3 + $0x38] sm:$0xff]  ;;  %v1753_v30 = vor.u32 %v2397_v22, %v1750_v24  ;;  %v1873_v31 = vor.u32 %v2426_v25, %v1870_v26  ;;  %v1812_v32 = vld [vmem:[%s3355_s1 + $0xa0] sm:$0xf]  ;;  %v2412_v34 = vld [vmem:[%s3355_s1 + $0xa4] sm:$0xf] }
  0x25   :  { %517 = vmatpush.bf16.msra.mxu1 %v1913_v35  ;;  %494 = vmatpush.bf16.msrb.mxu3 %v1737_v52  ;;  %v2419_v33 = vld [vmem:[%s3355_s1 + $0xd4] sm:$0xf0]  ;;  %v1814_v35 = vld [vmem:[%s3355_s1 + $0xd8] sm:$0xf0]  ;;  %v1756_v38 = vld [vmem:[%s3355_s1 + $0x30] sm:$0xf] }
  0x26   :  { %1936 = vmatmul.msk.bf16.vlgmr.msrb.gmra.mxu2 %vm392_vm0, %v2742_v57  ;;  %v2463_v36 = vld [vmem:[%s3357_s3 + $0x78] sm:$0xff]  ;;  %v1813_v37 = vor.u32 %v2419_v33, %v1812_v32  ;;  %v2405_v39 = vld [vmem:[%s3355_s1 + $0x64] sm:$0xf0]  ;;  %v1817_v40 = vor.u32 %v2412_v34, %v1814_v35  ;;  %v2454_v41 = vld [vmem:[%s3357_s3 + $0x30] sm:$0xff] }
  0x27   :  { %530 = vmatpush.bf16.msra.mxu2 %v1917_v46 }
  0x28   :  { %505 = vmatpush.bf16.msra.mxu0 %v1853_v45  ;;  %1937 = vmatmul.msk.bf16.vlgmr.msrb.gmra.mxu3 %vm392_vm0, %v2742_v57 }
  0x29   :  { %518 = vmatpush.bf16.msra.mxu1 %v1857_v49  ;;  %543 = vmatpush.bf16.msra.mxu3 %v1921_v55 }
  0x2b   :  { %531 = vmatpush.bf16.msra.mxu2 %v1861_v62 }
  0x2c   :  { %506 = vmatpush.bf16.msra.mxu0 %v1797_v59 }
  0x2d   :  { %519 = vmatpush.bf16.msra.mxu1 %v1801_v2  ;;  %544 = vmatpush.bf16.msra.mxu3 %v1865_v6 }
  0x2f   :  { %532 = vmatpush.bf16.msra.mxu2 %v1805_v14 }
  0x30   :  { %507 = vmatpush.bf16.msra.mxu0 %v1741_v10 }
  0x31   :  { %520 = vmatpush.bf16.msra.mxu1 %v1745_v17  ;;  %545 = vmatpush.bf16.msra.mxu3 %v1809_v21 }
  0x33   :  { %533 = vmatpush.bf16.msra.mxu2 %v1749_v27 }
  0x34   :  { %556 = vmatpush.bf16.msrb.mxu0 %v1925_v16 }
  0x35   :  { %569 = vmatpush.bf16.msrb.mxu1 %v1929_v23  ;;  %546 = vmatpush.bf16.msra.mxu3 %v1753_v30 }
  0x37   :  { %1506 = vmatpush.bf16.msrb.mxu2 %v2455_v29 }
  0x38   :  { %557 = vmatpush.bf16.msrb.mxu0 %v1869_v28 }
  0x39   :  { %570 = vmatpush.bf16.msrb.mxu1 %v1873_v31 }
  0x3a   :  { %10 = vsyncpa [#allocation3], 0  ;;  %v2398_v42 = vld [vmem:[%s3355_s1 + $0x34] sm:$0xf]  ;;  %v1758_v43 = vld [vmem:[%s3355_s1 + $0x68] sm:$0xf0]  ;;  %1519 = vmatpush.bf16.msrb.mxu3 %v2463_v36  ;;  %1938 = vmatmul.msk.bf16.vlgmr.msra.gmra.mxu0 %vm392_vm0, %v2742_v57  ;;  %v1757_v45 = vor.u32 %v2405_v39, %v1756_v38 }
  0x3b   :  { %v2462_v44 = vld [vmem:[%s3357_s3 + $0x70] sm:$0xff]  ;;  %1939 = vmatmul.msk.bf16.vlgmr.msra.gmra.mxu1 %vm392_vm0, %v2742_v57  ;;  %v1761_v46 = vor.u32 %v2398_v42, %v1758_v43  ;;  %1507 = vmatpush.bf16.msrb.mxu2 %v2454_v41  ;;  %v2453_v47 = vld [vmem:[%s3357_s3 + $0x28] sm:$0xff]  ;;  %v2471_v49 = vld [vmem:[%s3357_s3 + $0xb8] sm:$0xff]  ;;  %vm1688_vm1 = vcmask 64512  }
  0x3c   :  { %558 = vmatpush.bf16.msrb.mxu0 %v1813_v37  ;;  %1940 = vmatmul.msk.bf16.vlgmr.msra.gmra.mxu2 %vm392_vm0, %v2742_v57  ;;  %v2461_v48 = vld [vmem:[%s3357_s3 + $0x68] sm:$0xff]  ;;  %v2479_v50 = vld [vmem:[%s3357_s3 + $0xf8] sm:$0xff]  ;;  %v2452_v51 = vld [vmem:[%s3357_s3 + $0x20] sm:$0xff] }
  0x3d   :  { %571 = vmatpush.bf16.msrb.mxu1 %v1817_v40  ;;  %1941 = vmatmul.msk.bf16.vlgmr.msra.gmra.mxu3 %vm392_vm0, %v2742_v57  ;;  %v2460_v52 = vld [vmem:[%s3357_s3 + $0x60] sm:$0xff]  ;;  %v2470_v53 = vld [vmem:[%s3357_s3 + $0xb0] sm:$0xff]  ;;  %v2451_v55 = vld [vmem:[%s3357_s3 + $0x18] sm:$0xff] }
  0x3e   :  { %1520 = vmatpush.bf16.msrb.mxu3 %v2462_v44  ;;  %v2478_v54 = vld [vmem:[%s3357_s3 + $0xf0] sm:$0xff]  ;;  %v2459_v56 = vld [vmem:[%s3357_s3 + $0x58] sm:$0xff]  ;;  %v2469_v58 = vld [vmem:[%s3357_s3 + $0xa8] sm:$0xff] }
  0x3f   :  { %1508 = vmatpush.bf16.msrb.mxu2 %v2453_v47  ;;  %v2477_v59 = vld [vmem:[%s3357_s3 + $0xe8] sm:$0xff]  ;;  %v2450_v60 = vld [vmem:[%s3357_s3 + $0x10] sm:$0xff]  ;;  %v2468_v62 = vld [vmem:[%s3357_s3 + $0xa0] sm:$0xff] }
  0x40   :  { %559 = vmatpush.bf16.msrb.mxu0 %v1757_v45  ;;  %v2458_v61 = vld [vmem:[%s3357_s3 + $0x50] sm:$0xff]  ;;  %v2476_v63 = vld [vmem:[%s3357_s3 + $0xe0] sm:$0xff]  ;;  %v2449_v0 = vld [vmem:[%s3357_s3 + $0x8] sm:$0xff] }
  0x41   :  { %572 = vmatpush.bf16.msrb.mxu1 %v1761_v46  ;;  %v2457_v1 = vld [vmem:[%s3357_s3 + $0x48] sm:$0xff]  ;;  %v2467_v2 = vld [vmem:[%s3357_s3 + $0x98] sm:$0xff]  ;;  %v2448_v3 = vld [vmem:[%s3357_s3] sm:$0xff] }
  0x42   :  { %1521 = vmatpush.bf16.msrb.mxu3 %v2461_v48  ;;  %v2456_v4 = vld [vmem:[%s3357_s3 + $0x40] sm:$0xff]  ;;  %v2487_v5 = vld [vmem:[%s3357_s3 + $0x138] sm:$0xff]  ;;  %v2466_v7 = vld [vmem:[%s3357_s3 + $0x90] sm:$0xff] }
  0x43   :  { %1509 = vmatpush.bf16.msrb.mxu2 %v2452_v51  ;;  %v2495_v6 = vld [vmem:[%s3357_s3 + $0x178] sm:$0xff]  ;;  %v2474_v8 = vld [vmem:[%s3357_s3 + $0xd0] sm:$0xff]  ;;  %v2465_v11 = vld [vmem:[%s3357_s3 + $0x88] sm:$0xff] }
  0x44   :  { %1532 = vmatpush.bf16.msra.mxu0 %v2471_v49  ;;  %v2486_v9 = vld [vmem:[%s3357_s3 + $0x130] sm:$0xff]  ;;  %v2473_v12 = vld [vmem:[%s3357_s3 + $0xc8] sm:$0xff]  ;;  %v2464_v15 = vld [vmem:[%s3357_s3 + $0x80] sm:$0xff] }
  0x45   :  { %1545 = vmatpush.bf16.msra.mxu1 %v2479_v50  ;;  %v2494_v10 = vld [vmem:[%s3357_s3 + $0x170] sm:$0xff]  ;;  %v2485_v13 = vld [vmem:[%s3357_s3 + $0x128] sm:$0xff]  ;;  %v2503_v16 = vld [vmem:[%s3357_s3 + $0x1b8] sm:$0xff] }
  0x46   :  { %1522 = vmatpush.bf16.msrb.mxu3 %v2460_v52  ;;  %v2493_v14 = vld [vmem:[%s3357_s3 + $0x168] sm:$0xff]  ;;  %v2472_v17 = vld [vmem:[%s3357_s3 + $0xc0] sm:$0xff]  ;;  %v2511_v18 = vld [vmem:[%s3357_s3 + $0x1f8] sm:$0xff] }
  0x47   :  { %1510 = vmatpush.bf16.msrb.mxu2 %v2451_v55  ;;  %v2484_v19 = vld [vmem:[%s3357_s3 + $0x120] sm:$0xff]  ;;  %v2502_v21 = vld [vmem:[%s3357_s3 + $0x1b0] sm:$0xff]  ;;  %v2483_v23 = vld [vmem:[%s3357_s3 + $0x118] sm:$0xff] }
  0x48   :  { %1533 = vmatpush.bf16.msra.mxu0 %v2470_v53  ;;  %v2492_v20 = vld [vmem:[%s3357_s3 + $0x160] sm:$0xff]  ;;  %v2510_v22 = vld [vmem:[%s3357_s3 + $0x1f0] sm:$0xff]  ;;  %v2491_v24 = vld [vmem:[%s3357_s3 + $0x158] sm:$0xff] }
  0x49   :  { %1546 = vmatpush.bf16.msra.mxu1 %v2478_v54  ;;  %v2501_v25 = vld [vmem:[%s3357_s3 + $0x1a8] sm:$0xff]  ;;  %v2482_v27 = vld [vmem:[%s3357_s3 + $0x110] sm:$0xff]  ;;  %v2500_v29 = vld [vmem:[%s3357_s3 + $0x1a0] sm:$0xff] }
  0x4a   :  { %1523 = vmatpush.bf16.msrb.mxu3 %v2459_v56  ;;  %1942 = vmatmul.msk.bf16.vlgmr.msrb.gmra.mxu0 %vm392_vm0, %v2742_v57  ;;  %v2509_v26 = vld [vmem:[%s3357_s3 + $0x1e8] sm:$0xff]  ;;  %v2490_v28 = vld [vmem:[%s3357_s3 + $0x150] sm:$0xff]  ;;  %v2508_v32 = vld [vmem:[%s3357_s3 + $0x1e0] sm:$0xff] }
  0x4b   :  { %1943 = vmatmul.msk.bf16.vlgmr.msrb.gmra.mxu1 %vm392_vm0, %v2742_v57  ;;  %1511 = vmatpush.bf16.msrb.mxu2 %v2450_v60  ;;  %v2475_v57 = vld [vmem:[%s3357_s3 + $0xd8] sm:$0xff]  ;;  %v2481_v30 = vld [vmem:[%s3357_s3 + $0x108] sm:$0xff]  ;;  %v2480_v34 = vld [vmem:[%s3357_s3 + $0x100] sm:$0xff] }
  0x4c   :  { %1534 = vmatpush.bf16.msra.mxu0 %v2469_v58  ;;  %v2489_v31 = vld [vmem:[%s3357_s3 + $0x148] sm:$0xff]  ;;  %v2499_v33 = vld [vmem:[%s3357_s3 + $0x198] sm:$0xff]  ;;  %v2488_v35 = vld [vmem:[%s3357_s3 + $0x140] sm:$0xff] }
  0x4d   :  { %1547 = vmatpush.bf16.msra.mxu1 %v2477_v59  ;;  %v2507_v36 = vld [vmem:[%s3357_s3 + $0x1d8] sm:$0xff]  ;;  %v2498_v37 = vld [vmem:[%s3357_s3 + $0x190] sm:$0xff]  ;;  %v2497_v39 = vld [vmem:[%s3357_s3 + $0x188] sm:$0xff] }
  0x4e   :  { %1524 = vmatpush.bf16.msrb.mxu3 %v2458_v61  ;;  %v2506_v38 = vld [vmem:[%s3357_s3 + $0x1d0] sm:$0xff]  ;;  %v2505_v40 = vld [vmem:[%s3357_s3 + $0x1c8] sm:$0xff]  ;;  %v2496_v41 = vld [vmem:[%s3357_s3 + $0x180] sm:$0xff] }
  0x4f   :  { %1512 = vmatpush.bf16.msrb.mxu2 %v2449_v0  ;;  %v2504_v42 = vld [vmem:[%s3357_s3 + $0x1c0] sm:$0xff]  ;;  %v2519_v52 = vld [vmem:[%s3357_s3 + $0x238] sm:$0xff]  ;;  %v2518_v60 = vld [vmem:[%s3357_s3 + $0x230] sm:$0xff] }
  0x50   :  { %1535 = vmatpush.bf16.msra.mxu0 %v2468_v62  ;;  %v3183_v43 = vld [vmem:[%s3356_s2] sm:$0xff]  ;;  %v2527_v54 = vld [vmem:[%s3357_s3 + $0x278] sm:$0xff] }
  0x51   :  { %1548 = vmatpush.bf16.msra.mxu1 %v2476_v63  ;;  %v84_v44 = vperm.slane %v3183_v43, 0  ;;  %v85_v45 = vperm.slane %v3183_v43, 1  ;;  %v86_v56 = vperm.slane %v3183_v43, 2  ;;  %v87_v58 = vperm.slane %v3183_v43, 3  ;;  %v2526_v63 = vld [vmem:[%s3357_s3 + $0x270] sm:$0xff] }
  0x52   :  { %1525 = vmatpush.bf16.msrb.mxu3 %v2457_v1 }
  0x53   :  { %1513 = vmatpush.bf16.msrb.mxu2 %v2448_v3  ;;  %v2517_v3 = vld [vmem:[%s3357_s3 + $0x228] sm:$0xff] }
  0x54   :  { %1536 = vmatpush.bf16.msra.mxu0 %v2467_v2 }
  0x55   :  { %1549 = vmatpush.bf16.msra.mxu1 %v2475_v57 }
  0x56   :  { %1526 = vmatpush.bf16.msrb.mxu3 %v2456_v4 }
  0x57   :  { %1558 = vmatpush.bf16.msra.mxu2 %v2487_v5  ;;  %v2525_v5 = vld [vmem:[%s3357_s3 + $0x268] sm:$0xff] }
  0x58   :  { %1537 = vmatpush.bf16.msra.mxu0 %v2466_v7  ;;  %v2535_v7 = vld [vmem:[%s3357_s3 + $0x2b8] sm:$0xff] }
  0x59   :  { %1550 = vmatpush.bf16.msra.mxu1 %v2474_v8 }
  0x5a   :  { %1571 = vmatpush.bf16.msra.mxu3 %v2495_v6  ;;  %v88_v6 = vperm.slane %v3183_v43, 4 }
  0x5b   :  { %1559 = vmatpush.bf16.msra.mxu2 %v2486_v9  ;;  %v89_v9 = vperm.slane %v3183_v43, 5 }
  0x5c   :  { %1538 = vmatpush.bf16.msra.mxu0 %v2465_v11  ;;  %v2543_v11 = vld [vmem:[%s3357_s3 + $0x2f8] sm:$0xff] }
  0x5d   :  { %1551 = vmatpush.bf16.msra.mxu1 %v2473_v12 }
  0x5e   :  { %1572 = vmatpush.bf16.msra.mxu3 %v2494_v10 }
  0x5f   :  { %1560 = vmatpush.bf16.msra.mxu2 %v2485_v13  ;;  %v2516_v13 = vld [vmem:[%s3357_s3 + $0x220] sm:$0xff] }
  0x60   :  { %1539 = vmatpush.bf16.msra.mxu0 %v2464_v15 }
  0x61   :  { %1552 = vmatpush.bf16.msra.mxu1 %v2472_v17  ;;  %v2524_v17 = vld [vmem:[%s3357_s3 + $0x260] sm:$0xff] }
  0x62   :  { %1573 = vmatpush.bf16.msra.mxu3 %v2493_v14 }
  0x63   :  { %1561 = vmatpush.bf16.msra.mxu2 %v2484_v19 }
  0x64   :  { %1584 = vmatpush.bf16.msrb.mxu0 %v2503_v16 }
  0x65   :  { %1597 = vmatpush.bf16.msrb.mxu1 %v2511_v18  ;;  %v2534_v18 = vld [vmem:[%s3357_s3 + $0x2b0] sm:$0xff] }
  0x66   :  { %1574 = vmatpush.bf16.msra.mxu3 %v2492_v20 }
  0x67   :  { %1562 = vmatpush.bf16.msra.mxu2 %v2483_v23 }
  0x68   :  { %1585 = vmatpush.bf16.msrb.mxu0 %v2502_v21 }
  0x69   :  { %1598 = vmatpush.bf16.msrb.mxu1 %v2510_v22  ;;  %v2542_v22 = vld [vmem:[%s3357_s3 + $0x2f0] sm:$0xff] }
  0x6a   :  { %1575 = vmatpush.bf16.msra.mxu3 %v2491_v24  ;;  %v2515_v24 = vld [vmem:[%s3357_s3 + $0x218] sm:$0xff] }
  0x6b   :  { %1563 = vmatpush.bf16.msra.mxu2 %v2482_v27  ;;  %v2533_v27 = vld [vmem:[%s3357_s3 + $0x2a8] sm:$0xff] }
  0x6c   :  { %1586 = vmatpush.bf16.msrb.mxu0 %v2501_v25 }
  0x6d   :  { %1599 = vmatpush.bf16.msrb.mxu1 %v2509_v26  ;;  %v2523_v26 = vld [vmem:[%s3357_s3 + $0x258] sm:$0xff] }
  0x6e   :  { %1576 = vmatpush.bf16.msra.mxu3 %v2490_v28 }
  0x6f   :  { %1564 = vmatpush.bf16.msra.mxu2 %v2481_v30  ;;  %v91_v30 = vperm.slane %v3183_v43, 7 }
  0x70   :  { %1587 = vmatpush.bf16.msrb.mxu0 %v2500_v29  ;;  %v90_v29 = vperm.slane %v3183_v43, 6 }
  0x71   :  { %1600 = vmatpush.bf16.msrb.mxu1 %v2508_v32 }
  0x72   :  { %1577 = vmatpush.bf16.msra.mxu3 %v2489_v31  ;;  %v2541_v31 = vld [vmem:[%s3357_s3 + $0x2e8] sm:$0xff] }
  0x73   :  { %1565 = vmatpush.bf16.msra.mxu2 %v2480_v34 }
  0x74   :  { %1588 = vmatpush.bf16.msrb.mxu0 %v2499_v33  ;;  %v2514_v33 = vld [vmem:[%s3357_s3 + $0x210] sm:$0xff] }
  0x75   :  { %1601 = vmatpush.bf16.msrb.mxu1 %v2507_v36  ;;  %v2522_v36 = vld [vmem:[%s3357_s3 + $0x250] sm:$0xff] }
  0x76   :  { %1578 = vmatpush.bf16.msra.mxu3 %v2488_v35 }
  0x78   :  { %1589 = vmatpush.bf16.msrb.mxu0 %v2498_v37  ;;  %v2532_v37 = vld [vmem:[%s3357_s3 + $0x2a0] sm:$0xff] }
  0x79   :  { %1602 = vmatpush.bf16.msrb.mxu1 %v2506_v38 }
  0x7c   :  { %1590 = vmatpush.bf16.msrb.mxu0 %v2497_v39 }
  0x7d   :  { %1603 = vmatpush.bf16.msrb.mxu1 %v2505_v40  ;;  %v3253_v40 = vld [vmem:[%s3356_s2 + $0x8] sm:$0x3f]  ;;  %s1697_s2 = sshll.u32 %s3359_s5, 4  ;;  %s1698_s2 = int_to_ptr.hbm [resolvable:$true] %s1697_s2 }
  0x80   :  { %1591 = vmatpush.bf16.msrb.mxu0 %v2496_v41 }
  0x81   :  { %1604 = vmatpush.bf16.msrb.mxu1 %v2504_v42  ;;  %v2540_v42 = vld [vmem:[%s3357_s3 + $0x2e0] sm:$0xff] }
  0x90   :  { %v405_v46 = vpop.f32.mrf.mxu0 }
  0x91   :  { %v406_v47 = vadd.f32 %v405_v46, %v84_v44  ;;  %v418_v48 = vpop.f32.mrf.mxu1  ;;  %v2513_v44 = vld [vmem:[%s3357_s3 + $0x208] sm:$0xff] }
  0x92   :  { %v419_v49 = vadd.f32 %v418_v48, %v85_v45  ;;  %v2521_v46 = vld [vmem:[%s3357_s3 + $0x248] sm:$0xff]  ;;  %v2531_v48 = vld [vmem:[%s3357_s3 + $0x298] sm:$0xff] }
  0x93   :  { %v578_v50 = vmax.f32 %v406_v47, 0.0  ;;  %v92_v47 = vperm.slane %v3253_v40, 0 }
  0x94   :  { %v579_v51 = vmax.f32 %v419_v49, 0.0 }
  0x95   :  { %v592_v53 = vpack.c.bf16 %v578_v50, %v578_v50  ;;  %v93_v50 = vperm.slane %v3253_v40, 1 }
  0x96   :  { %v593_v55 = vpack.c.bf16 %v579_v51, %v579_v51 }
  0x97   :  { %1514 = vmatmul.bf16.vlgmr.msrb.gmra.mxu2 %v592_v53 }
  0x98   :  { %1527 = vmatmul.bf16.vlgmr.msrb.gmra.mxu3 %v593_v55  ;;  %1610 = vmatpush.bf16.msrb.mxu2 %v2519_v52  ;;  %v407_v59 = vpop.f32.mrf.mxu0  ;;  %v2539_v52 = vld [vmem:[%s3357_s3 + $0x2d8] sm:$0xff] }
  0x99   :  { %1623 = vmatpush.bf16.msrb.mxu3 %v2527_v54  ;;  %v420_v61 = vpop.f32.mrf.mxu1  ;;  %v431_v62 = vpop.f32.mrf.mxu2  ;;  %v2512_v54 = vld [vmem:[%s3357_s3 + $0x200] sm:$0xff] }
  0x9a   :  { %v432_v0 = vadd.f32 %v431_v62, %v86_v56  ;;  %v2520_v59 = vld [vmem:[%s3357_s3 + $0x240] sm:$0xff] }
  0x9b   :  { %v444_v1 = vpop.f32.mrf.mxu3 }
  0x9c   :  { %v445_v2 = vadd.f32 %v444_v1, %v87_v58  ;;  %v580_v57 = vmax.f32 %v432_v0, 0.0  ;;  %1611 = vmatpush.bf16.msrb.mxu2 %v2518_v60  ;;  %v2551_v60 = vld [vmem:[%s3357_s3 + $0x338] sm:$0xff]  ;;  %v2530_v0 = vld [vmem:[%s3357_s3 + $0x290] sm:$0xff] }
  0x9d   :  { %1624 = vmatpush.bf16.msrb.mxu3 %v2526_v63  ;;  %v2559_v63 = vld [vmem:[%s3357_s3 + $0x378] sm:$0xff] }
  0x9e   :  { %v581_v4 = vmax.f32 %v445_v2, 0.0  ;;  %v594_v8 = vpack.c.bf16 %v580_v57, %v580_v57  ;;  %v2538_v2 = vld [vmem:[%s3357_s3 + $0x2d0] sm:$0xff] }
  0xa0   :  { %v595_v10 = vpack.c.bf16 %v581_v4, %v581_v4  ;;  %1612 = vmatpush.bf16.msrb.mxu2 %v2517_v3  ;;  %v457_v12 = vpop.f32.mrf.mxu0  ;;  %1540 = vmatmul.bf16.vlgmr.msra.gmra.mxu0 %v594_v8  ;;  %v2550_v4 = vld [vmem:[%s3357_s3 + $0x330] sm:$0xff]  ;;  %v2529_v8 = vld [vmem:[%s3357_s3 + $0x288] sm:$0xff] }
  0xa1   :  { %1625 = vmatpush.bf16.msrb.mxu3 %v2525_v5  ;;  %v458_v14 = vadd.f32 %v457_v12, %v88_v6  ;;  %v433_v15 = vpop.f32.mrf.mxu2  ;;  %v470_v16 = vpop.f32.mrf.mxu1  ;;  %1636 = vmatpush.bf16.msra.mxu0 %v2535_v7  ;;  %v2558_v6 = vld [vmem:[%s3357_s3 + $0x370] sm:$0xff]  ;;  %v94_v7 = vperm.slane %v3253_v40, 2 }
  0xa2   :  { %v471_v19 = vadd.f32 %v470_v16, %v89_v9  ;;  %1553 = vmatmul.bf16.vlgmr.msra.gmra.mxu1 %v595_v10  ;;  %v95_v9 = vperm.slane %v3253_v40, 3  ;;  %v2537_v10 = vld [vmem:[%s3357_s3 + $0x2c8] sm:$0xff] }
  0xa3   :  { %v446_v20 = vpop.f32.mrf.mxu3  ;;  %v582_v21 = vmax.f32 %v458_v14, 0.0  ;;  %1649 = vmatpush.bf16.msra.mxu1 %v2543_v11  ;;  %v2549_v14 = vld [vmem:[%s3357_s3 + $0x328] sm:$0xff] }
  0xa4   :  { %v583_v23 = vmax.f32 %v471_v19, 0.0  ;;  %1613 = vmatpush.bf16.msrb.mxu2 %v2516_v13  ;;  %v2536_v20 = vld [vmem:[%s3357_s3 + $0x2c0] sm:$0xff] }
  0xa5   :  { %v596_v25 = vpack.c.bf16 %v582_v21, %v582_v21  ;;  %1626 = vmatpush.bf16.msrb.mxu3 %v2524_v17  ;;  %1637 = vmatpush.bf16.msra.mxu0 %v2534_v18  ;;  %v2557_v17 = vld [vmem:[%s3357_s3 + $0x368] sm:$0xff]  ;;  %v2528_v18 = vld [vmem:[%s3357_s3 + $0x280] sm:$0xff] }
  0xa6   :  { %v597_v28 = vpack.c.bf16 %v583_v23, %v583_v23  ;;  %v2548_v23 = vld [vmem:[%s3357_s3 + $0x320] sm:$0xff] }
  0xa7   :  { %1566 = vmatmul.bf16.vlgmr.msra.gmra.mxu2 %v596_v25  ;;  %1650 = vmatpush.bf16.msra.mxu1 %v2542_v22  ;;  %v2556_v25 = vld [vmem:[%s3357_s3 + $0x360] sm:$0xff] }
  0xa8   :  { %1614 = vmatpush.bf16.msrb.mxu2 %v2515_v24  ;;  %v459_v32 = vpop.f32.mrf.mxu0  ;;  %1579 = vmatmul.bf16.vlgmr.msra.gmra.mxu3 %v597_v28 }
  0xa9   :  { %1627 = vmatpush.bf16.msrb.mxu3 %v2523_v26  ;;  %v472_v34 = vpop.f32.mrf.mxu1  ;;  %v483_v35 = vpop.f32.mrf.mxu2  ;;  %1638 = vmatpush.bf16.msra.mxu0 %v2533_v27 }
  0xaa   :  { %v484_v38 = vadd.f32 %v483_v35, %v90_v29  ;;  %v2547_v29 = vld [vmem:[%s3357_s3 + $0x318] sm:$0xff]  ;;  %v97_v34 = vperm.slane %v3253_v40, 5  ;;  %v2546_v35 = vld [vmem:[%s3357_s3 + $0x310] sm:$0xff] }
  0xab   :  { %v496_v39 = vpop.f32.mrf.mxu3  ;;  %1651 = vmatpush.bf16.msra.mxu1 %v2541_v31  ;;  %v2555_v31 = vld [vmem:[%s3357_s3 + $0x358] sm:$0xff] }
  0xac   :  { %v497_v41 = vadd.f32 %v496_v39, %v91_v30  ;;  %v584_v43 = vmax.f32 %v484_v38, 0.0  ;;  %1615 = vmatpush.bf16.msrb.mxu2 %v2514_v33  ;;  %v96_v33 = vperm.slane %v3253_v40, 4  ;;  %v2553_v40 = vld [vmem:[%s3357_s3 + $0x348] sm:$0xff] }
  0xad   :  { %1628 = vmatpush.bf16.msrb.mxu3 %v2522_v36  ;;  %1639 = vmatpush.bf16.msra.mxu0 %v2532_v37  ;;  %v2554_v36 = vld [vmem:[%s3357_s3 + $0x350] sm:$0xff] }
  0xae   :  { %v585_v45 = vmax.f32 %v497_v41, 0.0  ;;  %v598_v49 = vpack.c.bf16 %v584_v43, %v584_v43 }
  0xaf   :  { %1652 = vmatpush.bf16.msra.mxu1 %v2540_v42  ;;  %v2545_v42 = vld [vmem:[%s3357_s3 + $0x308] sm:$0xff] }
  0xb0   :  { %v599_v51 = vpack.c.bf16 %v585_v45, %v585_v45  ;;  %1616 = vmatpush.bf16.msrb.mxu2 %v2513_v44  ;;  %1592 = vmatmul.bf16.vlgmr.msrb.gmra.mxu0 %v598_v49  ;;  %v2544_v45 = vld [vmem:[%s3357_s3 + $0x300] sm:$0xff] }
  0xb1   :  { %1629 = vmatpush.bf16.msrb.mxu3 %v2521_v46  ;;  %v485_v56 = vpop.f32.mrf.mxu2  ;;  %1640 = vmatpush.bf16.msra.mxu0 %v2531_v48  ;;  %v2552_v46 = vld [vmem:[%s3357_s3 + $0x340] sm:$0xff]  ;;  %s2588_s3 = smov [#allocation2]  }
  0xb2   :  { %1605 = vmatmul.bf16.vlgmr.msrb.gmra.mxu1 %v599_v51 }
  0xb3   :  { %v498_v62 = vpop.f32.mrf.mxu3  ;;  %1653 = vmatpush.bf16.msra.mxu1 %v2539_v52 }
  0xb4   :  { %1617 = vmatpush.bf16.msrb.mxu2 %v2512_v54 }
  0xb5   :  { %1630 = vmatpush.bf16.msrb.mxu3 %v2520_v59  ;;  %1641 = vmatpush.bf16.msra.mxu0 %v2530_v0 }
  0xb7   :  { %v509_v53 = vpop.f32.mrf.mxu0  ;;  %1654 = vmatpush.bf16.msra.mxu1 %v2538_v2 }
  0xb8   :  { %v510_v55 = vadd.f32 %v509_v53, %v92_v47  ;;  %v522_v58 = vpop.f32.mrf.mxu1  ;;  %1662 = vmatpush.bf16.msra.mxu2 %v2551_v60 }
  0xb9   :  { %v523_v61 = vadd.f32 %v522_v58, %v93_v50  ;;  %1675 = vmatpush.bf16.msra.mxu3 %v2559_v63  ;;  %1642 = vmatpush.bf16.msra.mxu0 %v2529_v8  ;;  %v2561_v58 = vld [vmem:[%s3358_s4] ss:$0 sm:$0xff]  ;;  %s1695_s4 = sshll.u32 %s2588_s3, 4  ;;  %s1696_s4 = int_to_ptr.vmem [resolvable:$true] %s1695_s4 }
  0xba   :  { %v586_v1 = vmax.f32 %v510_v55, 0.0 }
  0xbb   :  { %v587_v57 = vmax.f32 %v523_v61, 0.0  ;;  %1655 = vmatpush.bf16.msra.mxu1 %v2537_v10 }
  0xbc   :  { %v600_v3 = vpack.c.bf16 %v586_v1, %v586_v1  ;;  %1663 = vmatpush.bf16.msra.mxu2 %v2550_v4 }
  0xbd   :  { %v601_v5 = vpack.c.bf16 %v587_v57, %v587_v57  ;;  %1676 = vmatpush.bf16.msra.mxu3 %v2558_v6  ;;  %1643 = vmatpush.bf16.msra.mxu0 %v2528_v18 }
  0xbe   :  { %1618 = vmatmul.bf16.vlgmr.msrb.gmra.mxu2 %v600_v3 }
  0xbf   :  { %1631 = vmatmul.bf16.vlgmr.msrb.gmra.mxu3 %v601_v5  ;;  %v511_v11 = vpop.f32.mrf.mxu0  ;;  %v535_v12 = vpop.f32.mrf.mxu2  ;;  %1656 = vmatpush.bf16.msra.mxu1 %v2536_v20 }
  0xc0   :  { %v524_v13 = vpop.f32.mrf.mxu1  ;;  %v536_v15 = vadd.f32 %v535_v12, %v94_v7  ;;  %v548_v16 = vpop.f32.mrf.mxu3  ;;  %1664 = vmatpush.bf16.msra.mxu2 %v2549_v14 }
  0xc1   :  { %v549_v19 = vadd.f32 %v548_v16, %v95_v9  ;;  %1677 = vmatpush.bf16.msra.mxu3 %v2557_v17 }
  0xc2   :  { %v588_v21 = vmax.f32 %v536_v15, 0.0 }
  0xc3   :  { %v589_v22 = vmax.f32 %v549_v19, 0.0 }
  0xc4   :  { %v602_v24 = vpack.c.bf16 %v588_v21, %v588_v21  ;;  %1665 = vmatpush.bf16.msra.mxu2 %v2548_v23 }
  0xc5   :  { %v603_v26 = vpack.c.bf16 %v589_v22, %v589_v22  ;;  %1678 = vmatpush.bf16.msra.mxu3 %v2556_v25 }
  0xc6   :  { %1644 = vmatmul.bf16.vlgmr.msra.gmra.mxu0 %v602_v24 }
  0xc7   :  { %v561_v27 = vpop.f32.mrf.mxu0  ;;  %v537_v30 = vpop.f32.mrf.mxu2  ;;  %1657 = vmatmul.bf16.vlgmr.msra.gmra.mxu1 %v603_v26 }
  0xc8   :  { %v574_v28 = vpop.f32.mrf.mxu1  ;;  %v550_v32 = vpop.f32.mrf.mxu3  ;;  %1666 = vmatpush.bf16.msra.mxu2 %v2547_v29  ;;  %v562_v37 = vadd.f32 %v561_v27, %v96_v33 }
  0xc9   :  { %1679 = vmatpush.bf16.msra.mxu3 %v2555_v31  ;;  %v575_v39 = vadd.f32 %v574_v28, %v97_v34 }
  0xca   :  { %v590_v43 = vmax.f32 %v562_v37, 0.0 }
  0xcb   :  { %v591_v44 = vmax.f32 %v575_v39, 0.0 }
  0xcc   :  { %1667 = vmatpush.bf16.msra.mxu2 %v2546_v35  ;;  %v604_v47 = vpack.c.bf16 %v590_v43, %v590_v43 }
  0xcd   :  { %1680 = vmatpush.bf16.msra.mxu3 %v2554_v36  ;;  %v605_v48 = vpack.c.bf16 %v591_v44, %v591_v44 }
  0xcf   :  { %v563_v38 = vpop.f32.mrf.mxu0 }
  0xd0   :  { %v576_v41 = vpop.f32.mrf.mxu1  ;;  %1668 = vmatpush.bf16.msra.mxu2 %v2545_v42 }
  0xd1   :  { %1681 = vmatpush.bf16.msra.mxu3 %v2553_v40 }
  0xd4   :  { %1669 = vmatpush.bf16.msra.mxu2 %v2544_v45 }
  0xd5   :  { %1682 = vmatpush.bf16.msra.mxu3 %v2552_v46 }
  0xd7   :  { %1670 = vmatmul.bf16.vlgmr.msra.gmra.mxu2 %v604_v47 }
  0xd8   :  { %1683 = vmatmul.bf16.vlgmr.msra.gmra.mxu3 %v605_v48 }
 0x11a   :  { %v1515_v49 = vpop.f32.mrf.mxu2 }
 0x11b   :  { %v1528_v50 = vpop.f32.mrf.mxu3  ;;  %v1516_v62 = vadd.f32 %v2561_v58, %v1515_v49 }
 0x11d   :  { %v1541_v51 = vpop.f32.mrf.mxu0  ;;  %v1529_v0 = vadd.f32 %v1528_v50, %v1516_v62 }
 0x11f   :  { %v1554_v52 = vpop.f32.mrf.mxu1  ;;  %v1542_v3 = vadd.f32 %v1541_v51, %v1529_v0 }
 0x121   :  { %v1555_v5 = vadd.f32 %v1554_v52, %v1542_v3 }
 0x122   :  { %v1517_v53 = vpop.f32.mrf.mxu2 }
 0x123   :  { %v1530_v54 = vpop.f32.mrf.mxu3 }
 0x125   :  { %v1543_v55 = vpop.f32.mrf.mxu0 }
 0x127   :  { %v1556_v56 = vpop.f32.mrf.mxu1 }
 0x12a   :  { %v1567_v59 = vpop.f32.mrf.mxu2 }
 0x12b   :  { %v1580_v60 = vpop.f32.mrf.mxu3  ;;  %v1568_v8 = vadd.f32 %v1567_v59, %v1555_v5 }
 0x12d   :  { %v1593_v61 = vpop.f32.mrf.mxu0  ;;  %v1581_v11 = vadd.f32 %v1580_v60, %v1568_v8 }
 0x12f   :  { %v1606_v63 = vpop.f32.mrf.mxu1  ;;  %v1594_v14 = vadd.f32 %v1593_v61, %v1581_v11 }
 0x131   :  { %v1607_v17 = vadd.f32 %v1606_v63, %v1594_v14 }
 0x132   :  { %v1569_v1 = vpop.f32.mrf.mxu2 }
 0x133   :  { %v1582_v2 = vpop.f32.mrf.mxu3 }
 0x135   :  { %v1595_v57 = vpop.f32.mrf.mxu0 }
 0x137   :  { %v1608_v4 = vpop.f32.mrf.mxu1 }
 0x141   :  { %v1619_v6 = vpop.f32.mrf.mxu2 }
 0x142   :  { %v1632_v7 = vpop.f32.mrf.mxu3  ;;  %v1620_v18 = vadd.f32 %v1619_v6, %v1607_v17 }
 0x143   :  { %v1645_v9 = vpop.f32.mrf.mxu0 }
 0x144   :  { %v1658_v10 = vpop.f32.mrf.mxu1  ;;  %v1633_v19 = vadd.f32 %v1632_v7, %v1620_v18 }
 0x146   :  { %v1646_v20 = vadd.f32 %v1645_v9, %v1633_v19 }
 0x148   :  { %v1659_v21 = vadd.f32 %v1658_v10, %v1646_v20 }
 0x149   :  { %v1621_v12 = vpop.f32.mrf.mxu2 }
 0x14a   :  { %v1634_v13 = vpop.f32.mrf.mxu3 }
 0x14b   :  { %v1647_v15 = vpop.f32.mrf.mxu0 }
 0x14c   :  { %v1660_v16 = vpop.f32.mrf.mxu1 }
 0x15a   :  { %v1671_v22 = vpop.f32.mrf.mxu2 }
 0x15b   :  { %v1672_v23 = vadd.f32 %v1671_v22, %v1659_v21  ;;  %v1684_v24 = vpop.f32.mrf.mxu3 }
 0x15d   :  { %v1685_v25 = vadd.f32 %v1684_v24, %v1672_v23 }
 0x15f   :  { %1689 = vst.msk [vmem:[#allocation2] sm:$0xff] %vm1688_vm1, %v1685_v25 }
 0x160   :  { %1700 = dma.vmem_to_hbm [thread:$0]  %s1696_s4, 128, %s1698_s2, [#allocation3]  }
 0x162   :  { %v1673_v26 = vpop.f32.mrf.mxu2 }
 0x163   :  { %v1686_v27 = vpop.f32.mrf.mxu3 }
 0x164   :  { %2586 = dma.done.wait [#allocation3], 128  }
 0x165   :  { %2587 = vsyncadd [#allocation3], 4294967168 }
 0x166   :  { %1705 = vsyncpa [#allocation3], 1 }

// kernel: tpu_custom_call.1
= control target key start
LH: loop header
LB: loop body
LE: loop exit
PB: predicated region body
PF: predicated region fallthrough
CT: control target
= control target key end

     0   :  { %vm392_vm0 = vcmask 523264   ;;  %s3354_s0 = inlined_call_operand.vmem [shape: f32[8,64], index: 0, kind: input, shape index: {}]   ;;  %s3355_s1 = inlined_call_operand.vmem [shape: bf16[64,1792], index: 1, kind: input, shape index: {}]   ;;  %s3356_s2 = inlined_call_operand.vmem [shape: f32[1,1792], index: 2, kind: input, shape index: {}]   ;;  %s3357_s3 = inlined_call_operand.vmem [shape: bf16[1792,8], index: 3, kind: input, shape index: {}]   ;;  %s3358_s4 = inlined_call_operand.vmem [shape: f32[1,8], index: 4, kind: input, shape index: {}]   ;;  %s3359_s5 = inlined_call_operand.hbm [shape: f32[8,8], index: 5, kind: output, shape index: {}]  }
   0x1   :  { %v1876_v0 = vld [vmem:[%s3355_s1 + $0x150] sm:$0xf]  ;;  %v2441_v1 = vld [vmem:[%s3355_s1 + $0x184] sm:$0xf0]  ;;  %v2434_v2 = vld [vmem:[%s3355_s1 + $0x154] sm:$0xf] }
   0x2   :  { %v1877_v3 = vor.u32 %v2441_v1, %v1876_v0  ;;  %v1878_v4 = vld [vmem:[%s3355_s1 + $0x188] sm:$0xf0]  ;;  %v1820_v5 = vld [vmem:[%s3355_s1 + $0xe0] sm:$0xf]  ;;  %v2427_v6 = vld [vmem:[%s3355_s1 + $0x114] sm:$0xf0] }
   0x3   :  { %v1881_v7 = vor.u32 %v2434_v2, %v1878_v4  ;;  %v2420_v8 = vld [vmem:[%s3355_s1 + $0xe4] sm:$0xf]  ;;  %v1822_v9 = vld [vmem:[%s3355_s1 + $0x118] sm:$0xf0]  ;;  %v1884_v10 = vld [vmem:[%s3355_s1 + $0x158] sm:$0xf]  ;;  %v1821_v11 = vor.u32 %v2427_v6, %v1820_v5 }
   0x4   :  { %400 = vmatpush.bf16.msra.mxu0 %v1877_v3  ;;  %v2442_v12 = vld [vmem:[%s3355_s1 + $0x18c] sm:$0xf0]  ;;  %v2435_v13 = vld [vmem:[%s3355_s1 + $0x15c] sm:$0xf]  ;;  %v1886_v14 = vld [vmem:[%s3355_s1 + $0x190] sm:$0xf0]  ;;  %v1825_v15 = vor.u32 %v2420_v8, %v1822_v9 }
   0x5   :  { %413 = vmatpush.bf16.msra.mxu1 %v1881_v7  ;;  %v1885_v16 = vor.u32 %v2442_v12, %v1884_v10  ;;  %v1889_v17 = vor.u32 %v2435_v13, %v1886_v14  ;;  %v1764_v18 = vld [vmem:[%s3355_s1 + $0x70] sm:$0xf]  ;;  %v2413_v19 = vld [vmem:[%s3355_s1 + $0xa4] sm:$0xf0]  ;;  %v2406_v20 = vld [vmem:[%s3355_s1 + $0x74] sm:$0xf] }
   0x6   :  { %v1766_v21 = vld [vmem:[%s3355_s1 + $0xa8] sm:$0xf0]  ;;  %v1828_v22 = vld [vmem:[%s3355_s1 + $0xe8] sm:$0xf]  ;;  %v2428_v23 = vld [vmem:[%s3355_s1 + $0x11c] sm:$0xf0]  ;;  %v1765_v27 = vor.u32 %v2413_v19, %v1764_v18 }
   0x7   :  { %426 = vmatpush.bf16.msra.mxu2 %v1885_v16  ;;  %439 = vmatpush.bf16.msra.mxu3 %v1889_v17  ;;  %v1829_v24 = vor.u32 %v2428_v23, %v1828_v22  ;;  %v2421_v25 = vld [vmem:[%s3355_s1 + $0xec] sm:$0xf]  ;;  %v1830_v26 = vld [vmem:[%s3355_s1 + $0x120] sm:$0xf0]  ;;  %v1708_v29 = vld [vmem:[%s3355_s1] sm:$0xf]  ;;  %v1769_v32 = vor.u32 %v2406_v20, %v1766_v21 }
   0x8   :  { %401 = vmatpush.bf16.msra.mxu0 %v1821_v11  ;;  %v1833_v28 = vor.u32 %v2421_v25, %v1830_v26  ;;  %v2399_v30 = vld [vmem:[%s3355_s1 + $0x34] sm:$0xf0]  ;;  %v2392_v31 = vld [vmem:[%s3355_s1 + $0x4] sm:$0xf]  ;;  %v2414_v34 = vld [vmem:[%s3355_s1 + $0xac] sm:$0xf0] }
   0x9   :  { %414 = vmatpush.bf16.msra.mxu1 %v1825_v15  ;;  %v1772_v33 = vld [vmem:[%s3355_s1 + $0x78] sm:$0xf]  ;;  %v2407_v35 = vld [vmem:[%s3355_s1 + $0x7c] sm:$0xf]  ;;  %v1774_v37 = vld [vmem:[%s3355_s1 + $0xb0] sm:$0xf0]  ;;  %v1709_v44 = vor.u32 %v2399_v30, %v1708_v29 }
   0xa   :  { %v1710_v36 = vld [vmem:[%s3355_s1 + $0x38] sm:$0xf0]  ;;  %v22_v38 = vld [vmem:[%s3354_s0] sm:$0xff]  ;;  %v1773_v39 = vor.u32 %v2414_v34, %v1772_v33  ;;  %v1777_v40 = vor.u32 %v2407_v35, %v1774_v37  ;;  %v1716_v41 = vld [vmem:[%s3355_s1 + $0x8] sm:$0xf] }
   0xb   :  { %427 = vmatpush.bf16.msra.mxu2 %v1829_v24  ;;  %440 = vmatpush.bf16.msra.mxu3 %v1833_v28  ;;  %v1892_v42 = vld [vmem:[%s3355_s1 + $0x160] sm:$0xf]  ;;  %v2443_v43 = vld [vmem:[%s3355_s1 + $0x194] sm:$0xf0]  ;;  %v2393_v46 = vld [vmem:[%s3355_s1 + $0xc] sm:$0xf]  ;;  %v1713_v48 = vor.u32 %v2392_v31, %v1710_v36  ;;  %v2742_v57 = vpack.c.bf16 %v22_v38, %v22_v38 }
   0xc   :  { %402 = vmatpush.bf16.msra.mxu0 %v1765_v27  ;;  %v2400_v45 = vld [vmem:[%s3355_s1 + $0x3c] sm:$0xf0]  ;;  %v2436_v47 = vld [vmem:[%s3355_s1 + $0x164] sm:$0xf]  ;;  %v1893_v49 = vor.u32 %v2443_v43, %v1892_v42  ;;  %v1894_v51 = vld [vmem:[%s3355_s1 + $0x198] sm:$0xf0] }
   0xd   :  { %415 = vmatpush.bf16.msra.mxu1 %v1769_v32  ;;  %v1718_v50 = vld [vmem:[%s3355_s1 + $0x40] sm:$0xf0]  ;;  %v1836_v52 = vld [vmem:[%s3355_s1 + $0xf0] sm:$0xf]  ;;  %v1897_v53 = vor.u32 %v2436_v47, %v1894_v51  ;;  %v2429_v54 = vld [vmem:[%s3355_s1 + $0x124] sm:$0xf0]  ;;  %v1717_v58 = vor.u32 %v2400_v45, %v1716_v41 }
   0xe   :  { %v1900_v55 = vld [vmem:[%s3355_s1 + $0x168] sm:$0xf]  ;;  %v2444_v56 = vld [vmem:[%s3355_s1 + $0x19c] sm:$0xf0]  ;;  %v2422_v59 = vld [vmem:[%s3355_s1 + $0xf4] sm:$0xf]  ;;  %v1721_v61 = vor.u32 %v2393_v46, %v1718_v50  ;;  %v1837_v62 = vor.u32 %v2429_v54, %v1836_v52 }
   0xf   :  { %428 = vmatpush.bf16.msra.mxu2 %v1773_v39  ;;  %441 = vmatpush.bf16.msra.mxu3 %v1777_v40  ;;  %v1838_v60 = vld [vmem:[%s3355_s1 + $0x128] sm:$0xf0]  ;;  %v1901_v63 = vor.u32 %v2444_v56, %v1900_v55  ;;  %v1902_v1 = vld [vmem:[%s3355_s1 + $0x1a0] sm:$0xf0]  ;;  %v1780_v2 = vld [vmem:[%s3355_s1 + $0x80] sm:$0xf] }
  0x10   :  { %403 = vmatpush.bf16.msra.mxu0 %v1709_v44  ;;  %v2437_v0 = vld [vmem:[%s3355_s1 + $0x16c] sm:$0xf]  ;;  %v1841_v3 = vor.u32 %v2422_v59, %v1838_v60  ;;  %v2415_v4 = vld [vmem:[%s3355_s1 + $0xb4] sm:$0xf0]  ;;  %v2430_v6 = vld [vmem:[%s3355_s1 + $0x12c] sm:$0xf0] }
  0x11   :  { %416 = vmatpush.bf16.msra.mxu1 %v1713_v48  ;;  %v1844_v5 = vld [vmem:[%s3355_s1 + $0xf8] sm:$0xf]  ;;  %v2408_v7 = vld [vmem:[%s3355_s1 + $0x84] sm:$0xf]  ;;  %v1782_v8 = vld [vmem:[%s3355_s1 + $0xb8] sm:$0xf0]  ;;  %v1905_v9 = vor.u32 %v2437_v0, %v1902_v1  ;;  %v1781_v11 = vor.u32 %v2415_v4, %v1780_v2 }
  0x12   :  { %v2423_v10 = vld [vmem:[%s3355_s1 + $0xfc] sm:$0xf]  ;;  %v1845_v12 = vor.u32 %v2430_v6, %v1844_v5  ;;  %v1846_v13 = vld [vmem:[%s3355_s1 + $0x130] sm:$0xf0]  ;;  %v1724_v14 = vld [vmem:[%s3355_s1 + $0x10] sm:$0xf]  ;;  %v1785_v16 = vor.u32 %v2408_v7, %v1782_v8 }
  0x13   :  { %1930 = vmatmul.msk.bf16.vlgmr.msra.gmra.mxu0 %vm392_vm0, %v2742_v57  ;;  %429 = vmatpush.bf16.msra.mxu2 %v1717_v58  ;;  %v2401_v15 = vld [vmem:[%s3355_s1 + $0x44] sm:$0xf0]  ;;  %v2416_v18 = vld [vmem:[%s3355_s1 + $0xbc] sm:$0xf0]  ;;  %v2394_v19 = vld [vmem:[%s3355_s1 + $0x14] sm:$0xf]  ;;  %v1849_v23 = vor.u32 %v2423_v10, %v1846_v13 }
  0x14   :  { %452 = vmatpush.bf16.msrb.mxu0 %v1893_v49  ;;  %1931 = vmatmul.msk.bf16.vlgmr.msra.gmra.mxu1 %vm392_vm0, %v2742_v57  ;;  %v1788_v17 = vld [vmem:[%s3355_s1 + $0x88] sm:$0xf]  ;;  %v1726_v20 = vld [vmem:[%s3355_s1 + $0x48] sm:$0xf0]  ;;  %v1908_v21 = vld [vmem:[%s3355_s1 + $0x170] sm:$0xf]  ;;  %v1725_v26 = vor.u32 %v2401_v15, %v1724_v14 }
  0x15   :  { %465 = vmatpush.bf16.msrb.mxu1 %v1897_v53  ;;  %442 = vmatpush.bf16.msra.mxu3 %v1721_v61  ;;  %v2445_v22 = vld [vmem:[%s3355_s1 + $0x1a4] sm:$0xf0]  ;;  %v2438_v24 = vld [vmem:[%s3355_s1 + $0x174] sm:$0xf]  ;;  %v1910_v25 = vld [vmem:[%s3355_s1 + $0x1a8] sm:$0xf0]  ;;  %v1789_v27 = vor.u32 %v2416_v18, %v1788_v17  ;;  %v1729_v30 = vor.u32 %v2394_v19, %v1726_v20 }
  0x16   :  { %1932 = vmatmul.msk.bf16.vlgmr.msra.gmra.mxu2 %vm392_vm0, %v2742_v57  ;;  %v2409_v28 = vld [vmem:[%s3355_s1 + $0x8c] sm:$0xf]  ;;  %v1790_v29 = vld [vmem:[%s3355_s1 + $0xc0] sm:$0xf0]  ;;  %v1732_v31 = vld [vmem:[%s3355_s1 + $0x18] sm:$0xf]  ;;  %v1909_v33 = vor.u32 %v2445_v22, %v1908_v21  ;;  %v1913_v35 = vor.u32 %v2438_v24, %v1910_v25 }
  0x17   :  { %478 = vmatpush.bf16.msrb.mxu2 %v1901_v63  ;;  %v2402_v32 = vld [vmem:[%s3355_s1 + $0x4c] sm:$0xf0]  ;;  %v1852_v34 = vld [vmem:[%s3355_s1 + $0x100] sm:$0xf]  ;;  %v2431_v36 = vld [vmem:[%s3355_s1 + $0x134] sm:$0xf0]  ;;  %v1793_v39 = vor.u32 %v2409_v28, %v1790_v29 }
  0x18   :  { %453 = vmatpush.bf16.msrb.mxu0 %v1837_v62  ;;  %1933 = vmatmul.msk.bf16.vlgmr.msra.gmra.mxu3 %vm392_vm0, %v2742_v57  ;;  %v1916_v37 = vld [vmem:[%s3355_s1 + $0x178] sm:$0xf]  ;;  %v2446_v38 = vld [vmem:[%s3355_s1 + $0x1ac] sm:$0xf0]  ;;  %v2424_v40 = vld [vmem:[%s3355_s1 + $0x104] sm:$0xf]  ;;  %v1733_v42 = vor.u32 %v2402_v32, %v1732_v31  ;;  %v1853_v45 = vor.u32 %v2431_v36, %v1852_v34 }
  0x19   :  { %466 = vmatpush.bf16.msrb.mxu1 %v1841_v3  ;;  %491 = vmatpush.bf16.msrb.mxu3 %v1905_v9  ;;  %v1854_v41 = vld [vmem:[%s3355_s1 + $0x138] sm:$0xf0]  ;;  %v1734_v44 = vld [vmem:[%s3355_s1 + $0x50] sm:$0xf0]  ;;  %v1917_v46 = vor.u32 %v2446_v38, %v1916_v37  ;;  %v1796_v50 = vld [vmem:[%s3355_s1 + $0x90] sm:$0xf] }
  0x1a   :  { %v2395_v43 = vld [vmem:[%s3355_s1 + $0x1c] sm:$0xf]  ;;  %v1918_v48 = vld [vmem:[%s3355_s1 + $0x1b0] sm:$0xf0]  ;;  %v1857_v49 = vor.u32 %v2424_v40, %v1854_v41  ;;  %v2417_v51 = vld [vmem:[%s3355_s1 + $0xc4] sm:$0xf0] }
  0x1b   :  { %479 = vmatpush.bf16.msrb.mxu2 %v1845_v12  ;;  %v2439_v47 = vld [vmem:[%s3355_s1 + $0x17c] sm:$0xf]  ;;  %v1737_v52 = vor.u32 %v2395_v43, %v1734_v44  ;;  %v1860_v53 = vld [vmem:[%s3355_s1 + $0x108] sm:$0xf]  ;;  %v2432_v54 = vld [vmem:[%s3355_s1 + $0x13c] sm:$0xf0]  ;;  %v1797_v59 = vor.u32 %v2417_v51, %v1796_v50 }
  0x1c   :  { %454 = vmatpush.bf16.msrb.mxu0 %v1781_v11  ;;  %v1921_v55 = vor.u32 %v2439_v47, %v1918_v48  ;;  %v2410_v56 = vld [vmem:[%s3355_s1 + $0x94] sm:$0xf]  ;;  %v1798_v58 = vld [vmem:[%s3355_s1 + $0xc8] sm:$0xf0]  ;;  %v1862_v61 = vld [vmem:[%s3355_s1 + $0x140] sm:$0xf0]  ;;  %v1861_v62 = vor.u32 %v2432_v54, %v1860_v53 }
  0x1d   :  { %467 = vmatpush.bf16.msrb.mxu1 %v1785_v16  ;;  %492 = vmatpush.bf16.msrb.mxu3 %v1849_v23  ;;  %v2425_v60 = vld [vmem:[%s3355_s1 + $0x10c] sm:$0xf]  ;;  %v1740_v63 = vld [vmem:[%s3355_s1 + $0x20] sm:$0xf]  ;;  %v2403_v0 = vld [vmem:[%s3355_s1 + $0x54] sm:$0xf0]  ;;  %v1801_v2 = vor.u32 %v2410_v56, %v1798_v58 }
  0x1e   :  { %v1804_v1 = vld [vmem:[%s3355_s1 + $0x98] sm:$0xf]  ;;  %v2418_v3 = vld [vmem:[%s3355_s1 + $0xcc] sm:$0xf0]  ;;  %v1924_v4 = vld [vmem:[%s3355_s1 + $0x180] sm:$0xf]  ;;  %v1865_v6 = vor.u32 %v2425_v60, %v1862_v61  ;;  %v1741_v10 = vor.u32 %v2403_v0, %v1740_v63 }
  0x1f   :  { %480 = vmatpush.bf16.msrb.mxu2 %v1789_v27  ;;  %v2447_v5 = vld [vmem:[%s3355_s1 + $0x1b4] sm:$0xf0]  ;;  %v2396_v7 = vld [vmem:[%s3355_s1 + $0x24] sm:$0xf]  ;;  %v1742_v8 = vld [vmem:[%s3355_s1 + $0x58] sm:$0xf0]  ;;  %v1805_v14 = vor.u32 %v2418_v3, %v1804_v1 }
  0x20   :  { %455 = vmatpush.bf16.msrb.mxu0 %v1725_v26  ;;  %v2411_v9 = vld [vmem:[%s3355_s1 + $0x9c] sm:$0xf]  ;;  %v1806_v11 = vld [vmem:[%s3355_s1 + $0xd0] sm:$0xf0]  ;;  %v2440_v12 = vld [vmem:[%s3355_s1 + $0x184] sm:$0xf]  ;;  %v1925_v16 = vor.u32 %v2447_v5, %v1924_v4  ;;  %v1745_v17 = vor.u32 %v2396_v7, %v1742_v8 }
  0x21   :  { %468 = vmatpush.bf16.msrb.mxu1 %v1729_v30  ;;  %493 = vmatpush.bf16.msrb.mxu3 %v1793_v39  ;;  %v1926_v13 = vld [vmem:[%s3355_s1 + $0x1b8] sm:$0xf0]  ;;  %v1748_v15 = vld [vmem:[%s3355_s1 + $0x28] sm:$0xf]  ;;  %v2404_v18 = vld [vmem:[%s3355_s1 + $0x5c] sm:$0xf0]  ;;  %v1809_v21 = vor.u32 %v2411_v9, %v1806_v11 }
  0x22   :  { %v1868_v19 = vld [vmem:[%s3355_s1 + $0x110] sm:$0xf]  ;;  %v2433_v20 = vld [vmem:[%s3355_s1 + $0x144] sm:$0xf0]  ;;  %v2397_v22 = vld [vmem:[%s3355_s1 + $0x2c] sm:$0xf]  ;;  %v1929_v23 = vor.u32 %v2440_v12, %v1926_v13  ;;  %v1749_v27 = vor.u32 %v2404_v18, %v1748_v15 }
  0x23   :  { %481 = vmatpush.bf16.msrb.mxu2 %v1733_v42  ;;  %1934 = vmatmul.msk.bf16.vlgmr.msrb.gmra.mxu0 %vm392_vm0, %v2742_v57  ;;  %v1750_v24 = vld [vmem:[%s3355_s1 + $0x60] sm:$0xf0]  ;;  %v2426_v25 = vld [vmem:[%s3355_s1 + $0x114] sm:$0xf]  ;;  %v1870_v26 = vld [vmem:[%s3355_s1 + $0x148] sm:$0xf0]  ;;  %v1869_v28 = vor.u32 %v2433_v20, %v1868_v19 }
  0x24   :  { %504 = vmatpush.bf16.msra.mxu0 %v1909_v33  ;;  %1935 = vmatmul.msk.bf16.vlgmr.msrb.gmra.mxu1 %vm392_vm0, %v2742_v57  ;;  %v2455_v29 = vld [vmem:[%s3357_s3 + $0x38] sm:$0xff]  ;;  %v1753_v30 = vor.u32 %v2397_v22, %v1750_v24  ;;  %v1873_v31 = vor.u32 %v2426_v25, %v1870_v26  ;;  %v1812_v32 = vld [vmem:[%s3355_s1 + $0xa0] sm:$0xf]  ;;  %v2412_v34 = vld [vmem:[%s3355_s1 + $0xa4] sm:$0xf] }
  0x25   :  { %517 = vmatpush.bf16.msra.mxu1 %v1913_v35  ;;  %494 = vmatpush.bf16.msrb.mxu3 %v1737_v52  ;;  %v2419_v33 = vld [vmem:[%s3355_s1 + $0xd4] sm:$0xf0]  ;;  %v1814_v35 = vld [vmem:[%s3355_s1 + $0xd8] sm:$0xf0]  ;;  %v1756_v38 = vld [vmem:[%s3355_s1 + $0x30] sm:$0xf] }
  0x26   :  { %1936 = vmatmul.msk.bf16.vlgmr.msrb.gmra.mxu2 %vm392_vm0, %v2742_v57  ;;  %v2463_v36 = vld [vmem:[%s3357_s3 + $0x78] sm:$0xff]  ;;  %v1813_v37 = vor.u32 %v2419_v33, %v1812_v32  ;;  %v2405_v39 = vld [vmem:[%s3355_s1 + $0x64] sm:$0xf0]  ;;  %v1817_v40 = vor.u32 %v2412_v34, %v1814_v35  ;;  %v2454_v41 = vld [vmem:[%s3357_s3 + $0x30] sm:$0xff] }
  0x27   :  { %530 = vmatpush.bf16.msra.mxu2 %v1917_v46 }
  0x28   :  { %505 = vmatpush.bf16.msra.mxu0 %v1853_v45  ;;  %1937 = vmatmul.msk.bf16.vlgmr.msrb.gmra.mxu3 %vm392_vm0, %v2742_v57 }
  0x29   :  { %518 = vmatpush.bf16.msra.mxu1 %v1857_v49  ;;  %543 = vmatpush.bf16.msra.mxu3 %v1921_v55 }
  0x2b   :  { %531 = vmatpush.bf16.msra.mxu2 %v1861_v62 }
  0x2c   :  { %506 = vmatpush.bf16.msra.mxu0 %v1797_v59 }
  0x2d   :  { %519 = vmatpush.bf16.msra.mxu1 %v1801_v2  ;;  %544 = vmatpush.bf16.msra.mxu3 %v1865_v6 }
  0x2f   :  { %532 = vmatpush.bf16.msra.mxu2 %v1805_v14 }
  0x30   :  { %507 = vmatpush.bf16.msra.mxu0 %v1741_v10 }
  0x31   :  { %520 = vmatpush.bf16.msra.mxu1 %v1745_v17  ;;  %545 = vmatpush.bf16.msra.mxu3 %v1809_v21 }
  0x33   :  { %533 = vmatpush.bf16.msra.mxu2 %v1749_v27 }
  0x34   :  { %556 = vmatpush.bf16.msrb.mxu0 %v1925_v16 }
  0x35   :  { %569 = vmatpush.bf16.msrb.mxu1 %v1929_v23  ;;  %546 = vmatpush.bf16.msra.mxu3 %v1753_v30 }
  0x37   :  { %1506 = vmatpush.bf16.msrb.mxu2 %v2455_v29 }
  0x38   :  { %557 = vmatpush.bf16.msrb.mxu0 %v1869_v28 }
  0x39   :  { %570 = vmatpush.bf16.msrb.mxu1 %v1873_v31 }
  0x3a   :  { %10 = vsyncpa [#allocation3], 0  ;;  %v2398_v42 = vld [vmem:[%s3355_s1 + $0x34] sm:$0xf]  ;;  %v1758_v43 = vld [vmem:[%s3355_s1 + $0x68] sm:$0xf0]  ;;  %1519 = vmatpush.bf16.msrb.mxu3 %v2463_v36  ;;  %1938 = vmatmul.msk.bf16.vlgmr.msra.gmra.mxu0 %vm392_vm0, %v2742_v57  ;;  %v1757_v45 = vor.u32 %v2405_v39, %v1756_v38 }
  0x3b   :  { %v2462_v44 = vld [vmem:[%s3357_s3 + $0x70] sm:$0xff]  ;;  %1939 = vmatmul.msk.bf16.vlgmr.msra.gmra.mxu1 %vm392_vm0, %v2742_v57  ;;  %v1761_v46 = vor.u32 %v2398_v42, %v1758_v43  ;;  %1507 = vmatpush.bf16.msrb.mxu2 %v2454_v41  ;;  %v2453_v47 = vld [vmem:[%s3357_s3 + $0x28] sm:$0xff]  ;;  %v2471_v49 = vld [vmem:[%s3357_s3 + $0xb8] sm:$0xff]  ;;  %vm1688_vm1 = vcmask 64512  }
  0x3c   :  { %558 = vmatpush.bf16.msrb.mxu0 %v1813_v37  ;;  %1940 = vmatmul.msk.bf16.vlgmr.msra.gmra.mxu2 %vm392_vm0, %v2742_v57  ;;  %v2461_v48 = vld [vmem:[%s3357_s3 + $0x68] sm:$0xff]  ;;  %v2479_v50 = vld [vmem:[%s3357_s3 + $0xf8] sm:$0xff]  ;;  %v2452_v51 = vld [vmem:[%s3357_s3 + $0x20] sm:$0xff] }
  0x3d   :  { %571 = vmatpush.bf16.msrb.mxu1 %v1817_v40  ;;  %1941 = vmatmul.msk.bf16.vlgmr.msra.gmra.mxu3 %vm392_vm0, %v2742_v57  ;;  %v2460_v52 = vld [vmem:[%s3357_s3 + $0x60] sm:$0xff]  ;;  %v2470_v53 = vld [vmem:[%s3357_s3 + $0xb0] sm:$0xff]  ;;  %v2451_v55 = vld [vmem:[%s3357_s3 + $0x18] sm:$0xff] }
  0x3e   :  { %1520 = vmatpush.bf16.msrb.mxu3 %v2462_v44  ;;  %v2478_v54 = vld [vmem:[%s3357_s3 + $0xf0] sm:$0xff]  ;;  %v2459_v56 = vld [vmem:[%s3357_s3 + $0x58] sm:$0xff]  ;;  %v2469_v58 = vld [vmem:[%s3357_s3 + $0xa8] sm:$0xff] }
  0x3f   :  { %1508 = vmatpush.bf16.msrb.mxu2 %v2453_v47  ;;  %v2477_v59 = vld [vmem:[%s3357_s3 + $0xe8] sm:$0xff]  ;;  %v2450_v60 = vld [vmem:[%s3357_s3 + $0x10] sm:$0xff]  ;;  %v2468_v62 = vld [vmem:[%s3357_s3 + $0xa0] sm:$0xff] }
  0x40   :  { %559 = vmatpush.bf16.msrb.mxu0 %v1757_v45  ;;  %v2458_v61 = vld [vmem:[%s3357_s3 + $0x50] sm:$0xff]  ;;  %v2476_v63 = vld [vmem:[%s3357_s3 + $0xe0] sm:$0xff]  ;;  %v2449_v0 = vld [vmem:[%s3357_s3 + $0x8] sm:$0xff] }
  0x41   :  { %572 = vmatpush.bf16.msrb.mxu1 %v1761_v46  ;;  %v2457_v1 = vld [vmem:[%s3357_s3 + $0x48] sm:$0xff]  ;;  %v2467_v2 = vld [vmem:[%s3357_s3 + $0x98] sm:$0xff]  ;;  %v2448_v3 = vld [vmem:[%s3357_s3] sm:$0xff] }
  0x42   :  { %1521 = vmatpush.bf16.msrb.mxu3 %v2461_v48  ;;  %v2456_v4 = vld [vmem:[%s3357_s3 + $0x40] sm:$0xff]  ;;  %v2487_v5 = vld [vmem:[%s3357_s3 + $0x138] sm:$0xff]  ;;  %v2466_v7 = vld [vmem:[%s3357_s3 + $0x90] sm:$0xff] }
  0x43   :  { %1509 = vmatpush.bf16.msrb.mxu2 %v2452_v51  ;;  %v2495_v6 = vld [vmem:[%s3357_s3 + $0x178] sm:$0xff]  ;;  %v2474_v8 = vld [vmem:[%s3357_s3 + $0xd0] sm:$0xff]  ;;  %v2465_v11 = vld [vmem:[%s3357_s3 + $0x88] sm:$0xff] }
  0x44   :  { %1532 = vmatpush.bf16.msra.mxu0 %v2471_v49  ;;  %v2486_v9 = vld [vmem:[%s3357_s3 + $0x130] sm:$0xff]  ;;  %v2473_v12 = vld [vmem:[%s3357_s3 + $0xc8] sm:$0xff]  ;;  %v2464_v15 = vld [vmem:[%s3357_s3 + $0x80] sm:$0xff] }
  0x45   :  { %1545 = vmatpush.bf16.msra.mxu1 %v2479_v50  ;;  %v2494_v10 = vld [vmem:[%s3357_s3 + $0x170] sm:$0xff]  ;;  %v2485_v13 = vld [vmem:[%s3357_s3 + $0x128] sm:$0xff]  ;;  %v2503_v16 = vld [vmem:[%s3357_s3 + $0x1b8] sm:$0xff] }
  0x46   :  { %1522 = vmatpush.bf16.msrb.mxu3 %v2460_v52  ;;  %v2493_v14 = vld [vmem:[%s3357_s3 + $0x168] sm:$0xff]  ;;  %v2472_v17 = vld [vmem:[%s3357_s3 + $0xc0] sm:$0xff]  ;;  %v2511_v18 = vld [vmem:[%s3357_s3 + $0x1f8] sm:$0xff] }
  0x47   :  { %1510 = vmatpush.bf16.msrb.mxu2 %v2451_v55  ;;  %v2484_v19 = vld [vmem:[%s3357_s3 + $0x120] sm:$0xff]  ;;  %v2502_v21 = vld [vmem:[%s3357_s3 + $0x1b0] sm:$0xff]  ;;  %v2483_v23 = vld [vmem:[%s3357_s3 + $0x118] sm:$0xff] }
  0x48   :  { %1533 = vmatpush.bf16.msra.mxu0 %v2470_v53  ;;  %v2492_v20 = vld [vmem:[%s3357_s3 + $0x160] sm:$0xff]  ;;  %v2510_v22 = vld [vmem:[%s3357_s3 + $0x1f0] sm:$0xff]  ;;  %v2491_v24 = vld [vmem:[%s3357_s3 + $0x158] sm:$0xff] }
  0x49   :  { %1546 = vmatpush.bf16.msra.mxu1 %v2478_v54  ;;  %v2501_v25 = vld [vmem:[%s3357_s3 + $0x1a8] sm:$0xff]  ;;  %v2482_v27 = vld [vmem:[%s3357_s3 + $0x110] sm:$0xff]  ;;  %v2500_v29 = vld [vmem:[%s3357_s3 + $0x1a0] sm:$0xff] }
  0x4a   :  { %1523 = vmatpush.bf16.msrb.mxu3 %v2459_v56  ;;  %1942 = vmatmul.msk.bf16.vlgmr.msrb.gmra.mxu0 %vm392_vm0, %v2742_v57  ;;  %v2509_v26 = vld [vmem:[%s3357_s3 + $0x1e8] sm:$0xff]  ;;  %v2490_v28 = vld [vmem:[%s3357_s3 + $0x150] sm:$0xff]  ;;  %v2508_v32 = vld [vmem:[%s3357_s3 + $0x1e0] sm:$0xff] }
  0x4b   :  { %1943 = vmatmul.msk.bf16.vlgmr.msrb.gmra.mxu1 %vm392_vm0, %v2742_v57  ;;  %1511 = vmatpush.bf16.msrb.mxu2 %v2450_v60  ;;  %v2475_v57 = vld [vmem:[%s3357_s3 + $0xd8] sm:$0xff]  ;;  %v2481_v30 = vld [vmem:[%s3357_s3 + $0x108] sm:$0xff]  ;;  %v2480_v34 = vld [vmem:[%s3357_s3 + $0x100] sm:$0xff] }
  0x4c   :  { %1534 = vmatpush.bf16.msra.mxu0 %v2469_v58  ;;  %v2489_v31 = vld [vmem:[%s3357_s3 + $0x148] sm:$0xff]  ;;  %v2499_v33 = vld [vmem:[%s3357_s3 + $0x198] sm:$0xff]  ;;  %v2488_v35 = vld [vmem:[%s3357_s3 + $0x140] sm:$0xff] }
  0x4d   :  { %1547 = vmatpush.bf16.msra.mxu1 %v2477_v59  ;;  %v2507_v36 = vld [vmem:[%s3357_s3 + $0x1d8] sm:$0xff]  ;;  %v2498_v37 = vld [vmem:[%s3357_s3 + $0x190] sm:$0xff]  ;;  %v2497_v39 = vld [vmem:[%s3357_s3 + $0x188] sm:$0xff] }
  0x4e   :  { %1524 = vmatpush.bf16.msrb.mxu3 %v2458_v61  ;;  %v2506_v38 = vld [vmem:[%s3357_s3 + $0x1d0] sm:$0xff]  ;;  %v2505_v40 = vld [vmem:[%s3357_s3 + $0x1c8] sm:$0xff]  ;;  %v2496_v41 = vld [vmem:[%s3357_s3 + $0x180] sm:$0xff] }
  0x4f   :  { %1512 = vmatpush.bf16.msrb.mxu2 %v2449_v0  ;;  %v2504_v42 = vld [vmem:[%s3357_s3 + $0x1c0] sm:$0xff]  ;;  %v2519_v52 = vld [vmem:[%s3357_s3 + $0x238] sm:$0xff]  ;;  %v2518_v60 = vld [vmem:[%s3357_s3 + $0x230] sm:$0xff] }
  0x50   :  { %1535 = vmatpush.bf16.msra.mxu0 %v2468_v62  ;;  %v3183_v43 = vld [vmem:[%s3356_s2] sm:$0xff]  ;;  %v2527_v54 = vld [vmem:[%s3357_s3 + $0x278] sm:$0xff] }
  0x51   :  { %1548 = vmatpush.bf16.msra.mxu1 %v2476_v63  ;;  %v84_v44 = vperm.slane %v3183_v43, 0  ;;  %v85_v45 = vperm.slane %v3183_v43, 1  ;;  %v86_v56 = vperm.slane %v3183_v43, 2  ;;  %v87_v58 = vperm.slane %v3183_v43, 3  ;;  %v2526_v63 = vld [vmem:[%s3357_s3 + $0x270] sm:$0xff] }
  0x52   :  { %1525 = vmatpush.bf16.msrb.mxu3 %v2457_v1 }
  0x53   :  { %1513 = vmatpush.bf16.msrb.mxu2 %v2448_v3  ;;  %v2517_v3 = vld [vmem:[%s3357_s3 + $0x228] sm:$0xff] }
  0x54   :  { %1536 = vmatpush.bf16.msra.mxu0 %v2467_v2 }
  0x55   :  { %1549 = vmatpush.bf16.msra.mxu1 %v2475_v57 }
  0x56   :  { %1526 = vmatpush.bf16.msrb.mxu3 %v2456_v4 }
  0x57   :  { %1558 = vmatpush.bf16.msra.mxu2 %v2487_v5  ;;  %v2525_v5 = vld [vmem:[%s3357_s3 + $0x268] sm:$0xff] }
  0x58   :  { %1537 = vmatpush.bf16.msra.mxu0 %v2466_v7  ;;  %v2535_v7 = vld [vmem:[%s3357_s3 + $0x2b8] sm:$0xff] }
  0x59   :  { %1550 = vmatpush.bf16.msra.mxu1 %v2474_v8 }
  0x5a   :  { %1571 = vmatpush.bf16.msra.mxu3 %v2495_v6  ;;  %v88_v6 = vperm.slane %v3183_v43, 4 }
  0x5b   :  { %1559 = vmatpush.bf16.msra.mxu2 %v2486_v9  ;;  %v89_v9 = vperm.slane %v3183_v43, 5 }
  0x5c   :  { %1538 = vmatpush.bf16.msra.mxu0 %v2465_v11  ;;  %v2543_v11 = vld [vmem:[%s3357_s3 + $0x2f8] sm:$0xff] }
  0x5d   :  { %1551 = vmatpush.bf16.msra.mxu1 %v2473_v12 }
  0x5e   :  { %1572 = vmatpush.bf16.msra.mxu3 %v2494_v10 }
  0x5f   :  { %1560 = vmatpush.bf16.msra.mxu2 %v2485_v13  ;;  %v2516_v13 = vld [vmem:[%s3357_s3 + $0x220] sm:$0xff] }
  0x60   :  { %1539 = vmatpush.bf16.msra.mxu0 %v2464_v15 }
  0x61   :  { %1552 = vmatpush.bf16.msra.mxu1 %v2472_v17  ;;  %v2524_v17 = vld [vmem:[%s3357_s3 + $0x260] sm:$0xff] }
  0x62   :  { %1573 = vmatpush.bf16.msra.mxu3 %v2493_v14 }
  0x63   :  { %1561 = vmatpush.bf16.msra.mxu2 %v2484_v19 }
  0x64   :  { %1584 = vmatpush.bf16.msrb.mxu0 %v2503_v16 }
  0x65   :  { %1597 = vmatpush.bf16.msrb.mxu1 %v2511_v18  ;;  %v2534_v18 = vld [vmem:[%s3357_s3 + $0x2b0] sm:$0xff] }
  0x66   :  { %1574 = vmatpush.bf16.msra.mxu3 %v2492_v20 }
  0x67   :  { %1562 = vmatpush.bf16.msra.mxu2 %v2483_v23 }
  0x68   :  { %1585 = vmatpush.bf16.msrb.mxu0 %v2502_v21 }
  0x69   :  { %1598 = vmatpush.bf16.msrb.mxu1 %v2510_v22  ;;  %v2542_v22 = vld [vmem:[%s3357_s3 + $0x2f0] sm:$0xff] }
  0x6a   :  { %1575 = vmatpush.bf16.msra.mxu3 %v2491_v24  ;;  %v2515_v24 = vld [vmem:[%s3357_s3 + $0x218] sm:$0xff] }
  0x6b   :  { %1563 = vmatpush.bf16.msra.mxu2 %v2482_v27  ;;  %v2533_v27 = vld [vmem:[%s3357_s3 + $0x2a8] sm:$0xff] }
  0x6c   :  { %1586 = vmatpush.bf16.msrb.mxu0 %v2501_v25 }
  0x6d   :  { %1599 = vmatpush.bf16.msrb.mxu1 %v2509_v26  ;;  %v2523_v26 = vld [vmem:[%s3357_s3 + $0x258] sm:$0xff] }
  0x6e   :  { %1576 = vmatpush.bf16.msra.mxu3 %v2490_v28 }
  0x6f   :  { %1564 = vmatpush.bf16.msra.mxu2 %v2481_v30  ;;  %v91_v30 = vperm.slane %v3183_v43, 7 }
  0x70   :  { %1587 = vmatpush.bf16.msrb.mxu0 %v2500_v29  ;;  %v90_v29 = vperm.slane %v3183_v43, 6 }
  0x71   :  { %1600 = vmatpush.bf16.msrb.mxu1 %v2508_v32 }
  0x72   :  { %1577 = vmatpush.bf16.msra.mxu3 %v2489_v31  ;;  %v2541_v31 = vld [vmem:[%s3357_s3 + $0x2e8] sm:$0xff] }
  0x73   :  { %1565 = vmatpush.bf16.msra.mxu2 %v2480_v34 }
  0x74   :  { %1588 = vmatpush.bf16.msrb.mxu0 %v2499_v33  ;;  %v2514_v33 = vld [vmem:[%s3357_s3 + $0x210] sm:$0xff] }
  0x75   :  { %1601 = vmatpush.bf16.msrb.mxu1 %v2507_v36  ;;  %v2522_v36 = vld [vmem:[%s3357_s3 + $0x250] sm:$0xff] }
  0x76   :  { %1578 = vmatpush.bf16.msra.mxu3 %v2488_v35 }
  0x78   :  { %1589 = vmatpush.bf16.msrb.mxu0 %v2498_v37  ;;  %v2532_v37 = vld [vmem:[%s3357_s3 + $0x2a0] sm:$0xff] }
  0x79   :  { %1602 = vmatpush.bf16.msrb.mxu1 %v2506_v38 }
  0x7c   :  { %1590 = vmatpush.bf16.msrb.mxu0 %v2497_v39 }
  0x7d   :  { %1603 = vmatpush.bf16.msrb.mxu1 %v2505_v40  ;;  %v3253_v40 = vld [vmem:[%s3356_s2 + $0x8] sm:$0x3f]  ;;  %s1697_s2 = sshll.u32 %s3359_s5, 4  ;;  %s1698_s2 = int_to_ptr.hbm [resolvable:$true] %s1697_s2 }
  0x80   :  { %1591 = vmatpush.bf16.msrb.mxu0 %v2496_v41 }
  0x81   :  { %1604 = vmatpush.bf16.msrb.mxu1 %v2504_v42  ;;  %v2540_v42 = vld [vmem:[%s3357_s3 + $0x2e0] sm:$0xff] }
  0x90   :  { %v405_v46 = vpop.f32.mrf.mxu0 }
  0x91   :  { %v406_v47 = vadd.f32 %v405_v46, %v84_v44  ;;  %v418_v48 = vpop.f32.mrf.mxu1  ;;  %v2513_v44 = vld [vmem:[%s3357_s3 + $0x208] sm:$0xff] }
  0x92   :  { %v419_v49 = vadd.f32 %v418_v48, %v85_v45  ;;  %v2521_v46 = vld [vmem:[%s3357_s3 + $0x248] sm:$0xff]  ;;  %v2531_v48 = vld [vmem:[%s3357_s3 + $0x298] sm:$0xff] }
  0x93   :  { %v578_v50 = vmax.f32 %v406_v47, 0.0  ;;  %v92_v47 = vperm.slane %v3253_v40, 0 }
  0x94   :  { %v579_v51 = vmax.f32 %v419_v49, 0.0 }
  0x95   :  { %v592_v53 = vpack.c.bf16 %v578_v50, %v578_v50  ;;  %v93_v50 = vperm.slane %v3253_v40, 1 }
  0x96   :  { %v593_v55 = vpack.c.bf16 %v579_v51, %v579_v51 }
  0x97   :  { %1514 = vmatmul.bf16.vlgmr.msrb.gmra.mxu2 %v592_v53 }
  0x98   :  { %1527 = vmatmul.bf16.vlgmr.msrb.gmra.mxu3 %v593_v55  ;;  %1610 = vmatpush.bf16.msrb.mxu2 %v2519_v52  ;;  %v407_v59 = vpop.f32.mrf.mxu0  ;;  %v2539_v52 = vld [vmem:[%s3357_s3 + $0x2d8] sm:$0xff] }
  0x99   :  { %1623 = vmatpush.bf16.msrb.mxu3 %v2527_v54  ;;  %v420_v61 = vpop.f32.mrf.mxu1  ;;  %v431_v62 = vpop.f32.mrf.mxu2  ;;  %v2512_v54 = vld [vmem:[%s3357_s3 + $0x200] sm:$0xff] }
  0x9a   :  { %v432_v0 = vadd.f32 %v431_v62, %v86_v56  ;;  %v2520_v59 = vld [vmem:[%s3357_s3 + $0x240] sm:$0xff] }
  0x9b   :  { %v444_v1 = vpop.f32.mrf.mxu3 }
  0x9c   :  { %v445_v2 = vadd.f32 %v444_v1, %v87_v58  ;;  %v580_v57 = vmax.f32 %v432_v0, 0.0  ;;  %1611 = vmatpush.bf16.msrb.mxu2 %v2518_v60  ;;  %v2551_v60 = vld [vmem:[%s3357_s3 + $0x338] sm:$0xff]  ;;  %v2530_v0 = vld [vmem:[%s3357_s3 + $0x290] sm:$0xff] }
  0x9d   :  { %1624 = vmatpush.bf16.msrb.mxu3 %v2526_v63  ;;  %v2559_v63 = vld [vmem:[%s3357_s3 + $0x378] sm:$0xff] }
  0x9e   :  { %v581_v4 = vmax.f32 %v445_v2, 0.0  ;;  %v594_v8 = vpack.c.bf16 %v580_v57, %v580_v57  ;;  %v2538_v2 = vld [vmem:[%s3357_s3 + $0x2d0] sm:$0xff] }
  0xa0   :  { %v595_v10 = vpack.c.bf16 %v581_v4, %v581_v4  ;;  %1612 = vmatpush.bf16.msrb.mxu2 %v2517_v3  ;;  %v457_v12 = vpop.f32.mrf.mxu0  ;;  %1540 = vmatmul.bf16.vlgmr.msra.gmra.mxu0 %v594_v8  ;;  %v2550_v4 = vld [vmem:[%s3357_s3 + $0x330] sm:$0xff]  ;;  %v2529_v8 = vld [vmem:[%s3357_s3 + $0x288] sm:$0xff] }
  0xa1   :  { %1625 = vmatpush.bf16.msrb.mxu3 %v2525_v5  ;;  %v458_v14 = vadd.f32 %v457_v12, %v88_v6  ;;  %v433_v15 = vpop.f32.mrf.mxu2  ;;  %v470_v16 = vpop.f32.mrf.mxu1  ;;  %1636 = vmatpush.bf16.msra.mxu0 %v2535_v7  ;;  %v2558_v6 = vld [vmem:[%s3357_s3 + $0x370] sm:$0xff]  ;;  %v94_v7 = vperm.slane %v3253_v40, 2 }
  0xa2   :  { %v471_v19 = vadd.f32 %v470_v16, %v89_v9  ;;  %1553 = vmatmul.bf16.vlgmr.msra.gmra.mxu1 %v595_v10  ;;  %v95_v9 = vperm.slane %v3253_v40, 3  ;;  %v2537_v10 = vld [vmem:[%s3357_s3 + $0x2c8] sm:$0xff] }
  0xa3   :  { %v446_v20 = vpop.f32.mrf.mxu3  ;;  %v582_v21 = vmax.f32 %v458_v14, 0.0  ;;  %1649 = vmatpush.bf16.msra.mxu1 %v2543_v11  ;;  %v2549_v14 = vld [vmem:[%s3357_s3 + $0x328] sm:$0xff] }
  0xa4   :  { %v583_v23 = vmax.f32 %v471_v19, 0.0  ;;  %1613 = vmatpush.bf16.msrb.mxu2 %v2516_v13  ;;  %v2536_v20 = vld [vmem:[%s3357_s3 + $0x2c0] sm:$0xff] }
  0xa5   :  { %v596_v25 = vpack.c.bf16 %v582_v21, %v582_v21  ;;  %1626 = vmatpush.bf16.msrb.mxu3 %v2524_v17  ;;  %1637 = vmatpush.bf16.msra.mxu0 %v2534_v18  ;;  %v2557_v17 = vld [vmem:[%s3357_s3 + $0x368] sm:$0xff]  ;;  %v2528_v18 = vld [vmem:[%s3357_s3 + $0x280] sm:$0xff] }
  0xa6   :  { %v597_v28 = vpack.c.bf16 %v583_v23, %v583_v23  ;;  %v2548_v23 = vld [vmem:[%s3357_s3 + $0x320] sm:$0xff] }
  0xa7   :  { %1566 = vmatmul.bf16.vlgmr.msra.gmra.mxu2 %v596_v25  ;;  %1650 = vmatpush.bf16.msra.mxu1 %v2542_v22  ;;  %v2556_v25 = vld [vmem:[%s3357_s3 + $0x360] sm:$0xff] }
  0xa8   :  { %1614 = vmatpush.bf16.msrb.mxu2 %v2515_v24  ;;  %v459_v32 = vpop.f32.mrf.mxu0  ;;  %1579 = vmatmul.bf16.vlgmr.msra.gmra.mxu3 %v597_v28 }
  0xa9   :  { %1627 = vmatpush.bf16.msrb.mxu3 %v2523_v26  ;;  %v472_v34 = vpop.f32.mrf.mxu1  ;;  %v483_v35 = vpop.f32.mrf.mxu2  ;;  %1638 = vmatpush.bf16.msra.mxu0 %v2533_v27 }
  0xaa   :  { %v484_v38 = vadd.f32 %v483_v35, %v90_v29  ;;  %v2547_v29 = vld [vmem:[%s3357_s3 + $0x318] sm:$0xff]  ;;  %v97_v34 = vperm.slane %v3253_v40, 5  ;;  %v2546_v35 = vld [vmem:[%s3357_s3 + $0x310] sm:$0xff] }
  0xab   :  { %v496_v39 = vpop.f32.mrf.mxu3  ;;  %1651 = vmatpush.bf16.msra.mxu1 %v2541_v31  ;;  %v2555_v31 = vld [vmem:[%s3357_s3 + $0x358] sm:$0xff] }
  0xac   :  { %v497_v41 = vadd.f32 %v496_v39, %v91_v30  ;;  %v584_v43 = vmax.f32 %v484_v38, 0.0  ;;  %1615 = vmatpush.bf16.msrb.mxu2 %v2514_v33  ;;  %v96_v33 = vperm.slane %v3253_v40, 4  ;;  %v2553_v40 = vld [vmem:[%s3357_s3 + $0x348] sm:$0xff] }
  0xad   :  { %1628 = vmatpush.bf16.msrb.mxu3 %v2522_v36  ;;  %1639 = vmatpush.bf16.msra.mxu0 %v2532_v37  ;;  %v2554_v36 = vld [vmem:[%s3357_s3 + $0x350] sm:$0xff] }
  0xae   :  { %v585_v45 = vmax.f32 %v497_v41, 0.0  ;;  %v598_v49 = vpack.c.bf16 %v584_v43, %v584_v43 }
  0xaf   :  { %1652 = vmatpush.bf16.msra.mxu1 %v2540_v42  ;;  %v2545_v42 = vld [vmem:[%s3357_s3 + $0x308] sm:$0xff] }
  0xb0   :  { %v599_v51 = vpack.c.bf16 %v585_v45, %v585_v45  ;;  %1616 = vmatpush.bf16.msrb.mxu2 %v2513_v44  ;;  %1592 = vmatmul.bf16.vlgmr.msrb.gmra.mxu0 %v598_v49  ;;  %v2544_v45 = vld [vmem:[%s3357_s3 + $0x300] sm:$0xff] }
  0xb1   :  { %1629 = vmatpush.bf16.msrb.mxu3 %v2521_v46  ;;  %v485_v56 = vpop.f32.mrf.mxu2  ;;  %1640 = vmatpush.bf16.msra.mxu0 %v2531_v48  ;;  %v2552_v46 = vld [vmem:[%s3357_s3 + $0x340] sm:$0xff]  ;;  %s2588_s3 = smov [#allocation2]  }
  0xb2   :  { %1605 = vmatmul.bf16.vlgmr.msrb.gmra.mxu1 %v599_v51 }
  0xb3   :  { %v498_v62 = vpop.f32.mrf.mxu3  ;;  %1653 = vmatpush.bf16.msra.mxu1 %v2539_v52 }
  0xb4   :  { %1617 = vmatpush.bf16.msrb.mxu2 %v2512_v54 }
  0xb5   :  { %1630 = vmatpush.bf16.msrb.mxu3 %v2520_v59  ;;  %1641 = vmatpush.bf16.msra.mxu0 %v2530_v0 }
  0xb7   :  { %v509_v53 = vpop.f32.mrf.mxu0  ;;  %1654 = vmatpush.bf16.msra.mxu1 %v2538_v2 }
  0xb8   :  { %v510_v55 = vadd.f32 %v509_v53, %v92_v47  ;;  %v522_v58 = vpop.f32.mrf.mxu1  ;;  %1662 = vmatpush.bf16.msra.mxu2 %v2551_v60 }
  0xb9   :  { %v523_v61 = vadd.f32 %v522_v58, %v93_v50  ;;  %1675 = vmatpush.bf16.msra.mxu3 %v2559_v63  ;;  %1642 = vmatpush.bf16.msra.mxu0 %v2529_v8  ;;  %v2561_v58 = vld [vmem:[%s3358_s4] ss:$0 sm:$0xff]  ;;  %s1695_s4 = sshll.u32 %s2588_s3, 4  ;;  %s1696_s4 = int_to_ptr.vmem [resolvable:$true] %s1695_s4 }
  0xba   :  { %v586_v1 = vmax.f32 %v510_v55, 0.0 }
  0xbb   :  { %v587_v57 = vmax.f32 %v523_v61, 0.0  ;;  %1655 = vmatpush.bf16.msra.mxu1 %v2537_v10 }
  0xbc   :  { %v600_v3 = vpack.c.bf16 %v586_v1, %v586_v1  ;;  %1663 = vmatpush.bf16.msra.mxu2 %v2550_v4 }
  0xbd   :  { %v601_v5 = vpack.c.bf16 %v587_v57, %v587_v57  ;;  %1676 = vmatpush.bf16.msra.mxu3 %v2558_v6  ;;  %1643 = vmatpush.bf16.msra.mxu0 %v2528_v18 }
  0xbe   :  { %1618 = vmatmul.bf16.vlgmr.msrb.gmra.mxu2 %v600_v3 }
  0xbf   :  { %1631 = vmatmul.bf16.vlgmr.msrb.gmra.mxu3 %v601_v5  ;;  %v511_v11 = vpop.f32.mrf.mxu0  ;;  %v535_v12 = vpop.f32.mrf.mxu2  ;;  %1656 = vmatpush.bf16.msra.mxu1 %v2536_v20 }
  0xc0   :  { %v524_v13 = vpop.f32.mrf.mxu1  ;;  %v536_v15 = vadd.f32 %v535_v12, %v94_v7  ;;  %v548_v16 = vpop.f32.mrf.mxu3  ;;  %1664 = vmatpush.bf16.msra.mxu2 %v2549_v14 }
  0xc1   :  { %v549_v19 = vadd.f32 %v548_v16, %v95_v9  ;;  %1677 = vmatpush.bf16.msra.mxu3 %v2557_v17 }
  0xc2   :  { %v588_v21 = vmax.f32 %v536_v15, 0.0 }
  0xc3   :  { %v589_v22 = vmax.f32 %v549_v19, 0.0 }
  0xc4   :  { %v602_v24 = vpack.c.bf16 %v588_v21, %v588_v21  ;;  %1665 = vmatpush.bf16.msra.mxu2 %v2548_v23 }
  0xc5   :  { %v603_v26 = vpack.c.bf16 %v589_v22, %v589_v22  ;;  %1678 = vmatpush.bf16.msra.mxu3 %v2556_v25 }
  0xc6   :  { %1644 = vmatmul.bf16.vlgmr.msra.gmra.mxu0 %v602_v24 }
  0xc7   :  { %v561_v27 = vpop.f32.mrf.mxu0  ;;  %v537_v30 = vpop.f32.mrf.mxu2  ;;  %1657 = vmatmul.bf16.vlgmr.msra.gmra.mxu1 %v603_v26 }
  0xc8   :  { %v574_v28 = vpop.f32.mrf.mxu1  ;;  %v550_v32 = vpop.f32.mrf.mxu3  ;;  %1666 = vmatpush.bf16.msra.mxu2 %v2547_v29  ;;  %v562_v37 = vadd.f32 %v561_v27, %v96_v33 }
  0xc9   :  { %1679 = vmatpush.bf16.msra.mxu3 %v2555_v31  ;;  %v575_v39 = vadd.f32 %v574_v28, %v97_v34 }
  0xca   :  { %v590_v43 = vmax.f32 %v562_v37, 0.0 }
  0xcb   :  { %v591_v44 = vmax.f32 %v575_v39, 0.0 }
  0xcc   :  { %1667 = vmatpush.bf16.msra.mxu2 %v2546_v35  ;;  %v604_v47 = vpack.c.bf16 %v590_v43, %v590_v43 }
  0xcd   :  { %1680 = vmatpush.bf16.msra.mxu3 %v2554_v36  ;;  %v605_v48 = vpack.c.bf16 %v591_v44, %v591_v44 }
  0xcf   :  { %v563_v38 = vpop.f32.mrf.mxu0 }
  0xd0   :  { %v576_v41 = vpop.f32.mrf.mxu1  ;;  %1668 = vmatpush.bf16.msra.mxu2 %v2545_v42 }
  0xd1   :  { %1681 = vmatpush.bf16.msra.mxu3 %v2553_v40 }
  0xd4   :  { %1669 = vmatpush.bf16.msra.mxu2 %v2544_v45 }
  0xd5   :  { %1682 = vmatpush.bf16.msra.mxu3 %v2552_v46 }
  0xd7   :  { %1670 = vmatmul.bf16.vlgmr.msra.gmra.mxu2 %v604_v47 }
  0xd8   :  { %1683 = vmatmul.bf16.vlgmr.msra.gmra.mxu3 %v605_v48 }
 0x11a   :  { %v1515_v49 = vpop.f32.mrf.mxu2 }
 0x11b   :  { %v1528_v50 = vpop.f32.mrf.mxu3  ;;  %v1516_v62 = vadd.f32 %v2561_v58, %v1515_v49 }
 0x11d   :  { %v1541_v51 = vpop.f32.mrf.mxu0  ;;  %v1529_v0 = vadd.f32 %v1528_v50, %v1516_v62 }
 0x11f   :  { %v1554_v52 = vpop.f32.mrf.mxu1  ;;  %v1542_v3 = vadd.f32 %v1541_v51, %v1529_v0 }
 0x121   :  { %v1555_v5 = vadd.f32 %v1554_v52, %v1542_v3 }
 0x122   :  { %v1517_v53 = vpop.f32.mrf.mxu2 }
 0x123   :  { %v1530_v54 = vpop.f32.mrf.mxu3 }
 0x125   :  { %v1543_v55 = vpop.f32.mrf.mxu0 }
 0x127   :  { %v1556_v56 = vpop.f32.mrf.mxu1 }
 0x12a   :  { %v1567_v59 = vpop.f32.mrf.mxu2 }
 0x12b   :  { %v1580_v60 = vpop.f32.mrf.mxu3  ;;  %v1568_v8 = vadd.f32 %v1567_v59, %v1555_v5 }
 0x12d   :  { %v1593_v61 = vpop.f32.mrf.mxu0  ;;  %v1581_v11 = vadd.f32 %v1580_v60, %v1568_v8 }
 0x12f   :  { %v1606_v63 = vpop.f32.mrf.mxu1  ;;  %v1594_v14 = vadd.f32 %v1593_v61, %v1581_v11 }
 0x131   :  { %v1607_v17 = vadd.f32 %v1606_v63, %v1594_v14 }
 0x132   :  { %v1569_v1 = vpop.f32.mrf.mxu2 }
 0x133   :  { %v1582_v2 = vpop.f32.mrf.mxu3 }
 0x135   :  { %v1595_v57 = vpop.f32.mrf.mxu0 }
 0x137   :  { %v1608_v4 = vpop.f32.mrf.mxu1 }
 0x141   :  { %v1619_v6 = vpop.f32.mrf.mxu2 }
 0x142   :  { %v1632_v7 = vpop.f32.mrf.mxu3  ;;  %v1620_v18 = vadd.f32 %v1619_v6, %v1607_v17 }
 0x143   :  { %v1645_v9 = vpop.f32.mrf.mxu0 }
 0x144   :  { %v1658_v10 = vpop.f32.mrf.mxu1  ;;  %v1633_v19 = vadd.f32 %v1632_v7, %v1620_v18 }
 0x146   :  { %v1646_v20 = vadd.f32 %v1645_v9, %v1633_v19 }
 0x148   :  { %v1659_v21 = vadd.f32 %v1658_v10, %v1646_v20 }
 0x149   :  { %v1621_v12 = vpop.f32.mrf.mxu2 }
 0x14a   :  { %v1634_v13 = vpop.f32.mrf.mxu3 }
 0x14b   :  { %v1647_v15 = vpop.f32.mrf.mxu0 }
 0x14c   :  { %v1660_v16 = vpop.f32.mrf.mxu1 }
 0x15a   :  { %v1671_v22 = vpop.f32.mrf.mxu2 }
 0x15b   :  { %v1672_v23 = vadd.f32 %v1671_v22, %v1659_v21  ;;  %v1684_v24 = vpop.f32.mrf.mxu3 }
 0x15d   :  { %v1685_v25 = vadd.f32 %v1684_v24, %v1672_v23 }
 0x15f   :  { %1689 = vst.msk [vmem:[#allocation2] sm:$0xff] %vm1688_vm1, %v1685_v25 }
 0x160   :  { %1700 = dma.vmem_to_hbm [thread:$0]  %s1696_s4, 128, %s1698_s2, [#allocation3]  }
 0x162   :  { %v1673_v26 = vpop.f32.mrf.mxu2 }
 0x163   :  { %v1686_v27 = vpop.f32.mrf.mxu3 }
 0x164   :  { %2586 = dma.done.wait [#allocation3], 128  }
 0x165   :  { %2587 = vsyncadd [#allocation3], 4294967168 }
 0x166   :  { %1705 = vsyncpa [#allocation3], 1 }

</bundles_post_ra>
